<compile_context>
chip_gen: v5e
topology: v5e:2x2
jax: 0.10.0
libtpu: 0.0.40
codegen_flags: <defaults>
</compile_context>

<pallas_src>
import functools

import jax
import jax.numpy as jnp
import numpy as np
from jax import lax
from jax.experimental import pallas as pl
from jax.experimental.pallas import tpu as pltpu


def _round_up(x, m):
    return ((x + m - 1) // m) * m


def _softplus(x):
    # numerically stable softplus
    return jnp.log1p(jnp.exp(-jnp.abs(x))) + jnp.maximum(x, 0.0)


def _sigmoid(x, approx):
    z = 1.0 + jnp.exp(-x)
    if approx:
        return pl.reciprocal(z, approx=True)   # EUP slot, nearly free
    return 1.0 / z


# ---------------------------------------------------------------------------
# Pass 1: per-edge messages.  grid = (n_edge_tiles,), fully parallel.
# ---------------------------------------------------------------------------
def _message_kernel(idx_ref, edge_ref, node_ref, w_gate_ref, w_upd_ref,
                    b_gate_ref, b_upd_ref, msg_ref, *, n_nodes, approx_sigmoid):
    te = edge_ref.shape[0]

    # stacked src/dst gather as a single one-hot matmul: (2TE, N) @ (N, F)
    idx2 = idx_ref[...]                                               # (2TE, 1) = [src; dst]
    giota = lax.broadcasted_iota(jnp.int32, (2 * te, n_nodes), 1)
    oh2 = (idx2 == giota).astype(jnp.bfloat16)                        # (2TE, N)
    h2 = jnp.dot(oh2, node_ref[...], preferred_element_type=jnp.float32)  # (2TE, F) f32

    # deep-K operand: z = [h_src | h_dst | e]  -> (TE, 2F+Fe) bf16
    z = jnp.concatenate(
        [h2[:te].astype(jnp.bfloat16),
         h2[te:].astype(jnp.bfloat16),
         edge_ref[...]], axis=1)

    # gate / update kept as two separate matmul outputs (no mid-tile lane slice)
    pre_g = jnp.dot(z, w_gate_ref[...], preferred_element_type=jnp.float32) + b_gate_ref[...]
    pre_u = jnp.dot(z, w_upd_ref[...], preferred_element_type=jnp.float32) + b_upd_ref[...]

    msg_ref[...] = (_sigmoid(pre_g, approx_sigmoid) * _softplus(pre_u)).astype(msg_ref.dtype)


# ---------------------------------------------------------------------------
# Pass 2: scatter-add + node BatchNorm (folded) + residual softplus.
# grid = (n_node_tiles, n_edge_tiles); edge axis is the reduction.
# ---------------------------------------------------------------------------
def _scatter_kernel(dst_row_ref, msg_ref, node_res_ref, bn_scale_ref, bn_shift_ref,
                    out_ref, *, node_tile):
    nt = pl.program_id(0)
    ke = pl.program_id(1)

    @pl.when(ke == 0)
    def _():
        out_ref[...] = jnp.zeros_like(out_ref)

    te = msg_ref.shape[0]
    node_base = nt * node_tile
    # scatter one-hot built directly in (tile_nodes, TE) layout -> no transpose
    siota = node_base + lax.broadcasted_iota(jnp.int32, (node_tile, te), 0)
    dst_oh_t = (dst_row_ref[...] == siota).astype(jnp.bfloat16)       # (tn, TE)
    out_ref[...] += jnp.dot(dst_oh_t, msg_ref[...], preferred_element_type=jnp.float32)

    @pl.when(ke == pl.num_programs(1) - 1)
    def _():
        h_bn = out_ref[...] * bn_scale_ref[...] + bn_shift_ref[...]
        out_ref[...] = _softplus(node_res_ref[...] + h_bn)


# ---------------------------------------------------------------------------
# Wrapper
# ---------------------------------------------------------------------------
def cgcnn_conv_full(node_feats, edge_feats, src, dst, params, *,
                    edge_tile=512, node_tile=None, approx_sigmoid=True,
                    vmem_limit_bytes=None):
    n_nodes, f_node = node_feats.shape
    n_edges, f_edge = edge_feats.shape
    in_feats = 2 * f_node + f_edge

    if node_tile is None:
        node_tile = n_nodes                 # single resident accumulator by default
    assert n_nodes % node_tile == 0
    assert node_tile == n_nodes or node_tile % 8 == 0
    n_node_tiles = n_nodes // node_tile

    # edge_tile: large default to amortize per-step overhead and lengthen MXU M.
    if n_edges <= edge_tile:
        edge_tile = _round_up(max(n_edges, 8), 8)     # single edge tile
    else:
        edge_tile = _round_up(edge_tile, 128)         # multi-tile: lane-aligned dst row

    # --- pad edges; contract: padded dst = -1 (dropped by scatter), src = 0.
    n_edges_pad = _round_up(n_edges, edge_tile)
    pad = n_edges_pad - n_edges
    src_p = src.astype(jnp.int32)
    dst_p = dst.astype(jnp.int32)
    edge_p = edge_feats.astype(jnp.bfloat16)          # streamed bf16
    if pad:
        src_p = jnp.concatenate([src_p, jnp.zeros((pad,), jnp.int32)])
        dst_p = jnp.concatenate([dst_p, jnp.full((pad,), -1, jnp.int32)])
        edge_p = jnp.concatenate([edge_p, jnp.zeros((pad, f_edge), jnp.bfloat16)])
    n_edge_tiles = n_edges_pad // edge_tile

    # stacked per-tile [src_tile; dst_tile] index column; dst as a row for scatter
    src_t = src_p.reshape(n_edge_tiles, edge_tile)
    dst_t = dst_p.reshape(n_edge_tiles, edge_tile)
    idx_stacked = jnp.concatenate([src_t, dst_t], axis=1).reshape(
        n_edge_tiles * 2 * edge_tile, 1)
    dst_row = dst_p.reshape(1, n_edges_pad)

    # parameters (edge-branch BN already folded host-side, eval mode)
    w_gate = params["w_gate"].astype(jnp.bfloat16)    # (2F+Fe, F)
    w_upd = params["w_upd"].astype(jnp.bfloat16)
    b_gate = params["b_gate"].astype(jnp.float32)
    b_upd = params["b_upd"].astype(jnp.float32)
    bn_scale = params["bn_scale"].astype(jnp.float32)
    bn_shift = params["bn_shift"].astype(jnp.float32)

    node_bf16 = node_feats.astype(jnp.bfloat16)       # gather operand
    node_f32 = node_feats.astype(jnp.float32)         # residual operand

    # --- VMEM budgets: only raise the scoped limit when the default would be tight.
    def _maybe_vmem(estimate):
        if vmem_limit_bytes is not None:
            return dict(vmem_limit_bytes=int(vmem_limit_bytes))
        if estimate > 12 * 1024 * 1024:               # v5e default scoped limit is 16 MiB
            return dict(vmem_limit_bytes=int(min(2 * estimate, 64 * 1024 * 1024)))
        return {}

    est1 = (2 * (2 * edge_tile * 4)                    # idx (double-buffered)
            + 2 * (edge_tile * f_edge * 2)             # edge bf16
            + 2 * (n_nodes * f_node * 2)               # node table bf16
            + 2 * 2 * (in_feats * f_node * 2)          # w_gate + w_upd
            + 2 * (edge_tile * f_node * 2)             # msg out
            + 2 * edge_tile * n_nodes * 4              # one-hot + iota temporaries
            + 2 * edge_tile * f_node * 4               # h2 f32
            + edge_tile * in_feats * 2                 # z bf16
            + 6 * edge_tile * f_node * 4)              # pre/gate/upd temporaries
    est2 = (2 * (edge_tile * 4)
            + 2 * (edge_tile * f_node * 2)
            + 4 * (node_tile * f_node * 4)
            + 4 * node_tile * edge_tile)

    # ---- pass 1: messages ----------------------------------------------------
    msg = pl.pallas_call(
        functools.partial(_message_kernel, n_nodes=n_nodes,
                          approx_sigmoid=approx_sigmoid),
        out_shape=jax.ShapeDtypeStruct((n_edges_pad, f_node), jnp.bfloat16),
        grid_spec=pltpu.PrefetchScalarGridSpec(
            num_scalar_prefetch=0,
            grid=(n_edge_tiles,),
            in_specs=[
                pl.BlockSpec((2 * edge_tile, 1), lambda ke: (ke, 0)),     # [src; dst] idx
                pl.BlockSpec((edge_tile, f_edge), lambda ke: (ke, 0)),    # edge feats bf16
                pl.BlockSpec((n_nodes, f_node), lambda ke: (0, 0)),       # node table bf16
                pl.BlockSpec((in_feats, f_node), lambda ke: (0, 0)),      # w_gate
                pl.BlockSpec((in_feats, f_node), lambda ke: (0, 0)),      # w_upd
                pl.BlockSpec((1, f_node), lambda ke: (0, 0)),             # b_gate
                pl.BlockSpec((1, f_node), lambda ke: (0, 0)),             # b_upd
            ],
            out_specs=pl.BlockSpec((edge_tile, f_node), lambda ke: (ke, 0)),
        ),
        compiler_params=pltpu.CompilerParams(
            dimension_semantics=("parallel",), **_maybe_vmem(est1)),
    )(idx_stacked, edge_p, node_bf16, w_gate, w_upd, b_gate, b_upd)

    # ---- pass 2: scatter + BN + residual softplus -----------------------------
    out = pl.pallas_call(
        functools.partial(_scatter_kernel, node_tile=node_tile),
        out_shape=jax.ShapeDtypeStruct((n_nodes, f_node), jnp.float32),
        grid_spec=pltpu.PrefetchScalarGridSpec(
            num_scalar_prefetch=0,
            grid=(n_node_tiles, n_edge_tiles),
            in_specs=[
                pl.BlockSpec((1, edge_tile), lambda nt, ke: (0, ke)),         # dst row
                pl.BlockSpec((edge_tile, f_node), lambda nt, ke: (ke, 0)),    # messages
                pl.BlockSpec((node_tile, f_node), lambda nt, ke: (nt, 0)),    # residual
                pl.BlockSpec((1, f_node), lambda nt, ke: (0, 0)),             # bn scale
                pl.BlockSpec((1, f_node), lambda nt, ke: (0, 0)),             # bn shift
            ],
            out_specs=pl.BlockSpec((node_tile, f_node), lambda nt, ke: (nt, 0)),
        ),
        compiler_params=pltpu.CompilerParams(
            dimension_semantics=("parallel", "arbitrary"), **_maybe_vmem(est2)),
    )(dst_row, msg, node_f32, bn_scale, bn_shift)

    return out


# ---------------------------------------------------------------------------
# Parameters & pure-JAX reference
# ---------------------------------------------------------------------------
def make_params(key, node_features, edge_features):
    """nn.Linear default init; eval-mode BatchNorm folded (gamma=1, beta=0,
    running_mean=0, running_var=1, eps=1e-5)."""
    in_feats = 2 * node_features + edge_features
    eps = 1e-5
    k1, k2, k3, k4 = jax.random.split(key, 4)
    bound = 1.0 / np.sqrt(in_feats)
    w_gate = jax.random.uniform(k1, (in_feats, node_features), jnp.float32, -bound, bound)
    b_gate = jax.random.uniform(k2, (1, node_features), jnp.float32, -bound, bound)
    w_upd = jax.random.uniform(k3, (in_feats, node_features), jnp.float32, -bound, bound)
    b_upd = jax.random.uniform(k4, (1, node_features), jnp.float32, -bound, bound)

    bn_scale_edge = 1.0 / np.sqrt(1.0 + eps)
    w_gate = w_gate * bn_scale_edge
    b_gate = b_gate * bn_scale_edge
    w_upd = w_upd * bn_scale_edge
    b_upd = b_upd * bn_scale_edge

    bn_scale = jnp.full((1, node_features), 1.0 / np.sqrt(1.0 + eps), jnp.float32)
    bn_shift = jnp.zeros((1, node_features), jnp.float32)

    return dict(w_gate=w_gate, b_gate=b_gate, w_upd=w_upd, b_upd=b_upd,
                bn_scale=bn_scale, bn_shift=bn_shift)


def reference(node_feats, edge_feats, src, dst, params):
    """Pure-JAX f32 reference of the same forward pass."""
    z = jnp.concatenate([node_feats[src], node_feats[dst], edge_feats], axis=1)
    gate = jax.nn.sigmoid(z @ params["w_gate"] + params["b_gate"])
    upd = jax.nn.softplus(z @ params["w_upd"] + params["b_upd"])
    msg = gate * upd
    h_agg = jax.ops.segment_sum(msg, dst, num_segments=node_feats.shape[0])
    h_bn = h_agg * params["bn_scale"] + params["bn_shift"]
    return jax.nn.softplus(node_feats + h_bn)


if __name__ == "__main__":
    NODE_FEATURES = 64     # module defaults
    EDGE_FEATURES = 32
    N_NODES = 32
    N_EDGES = 200          # not a tile multiple -> exercises the padding contract

    key = jax.random.PRNGKey(0)
    k_nodes, k_edges, k_src, k_dst, k_params = jax.random.split(key, 5)

    node_feats = jax.random.normal(k_nodes, (N_NODES, NODE_FEATURES), jnp.float32)
    edge_feats = jax.random.normal(k_edges, (N_EDGES, EDGE_FEATURES), jnp.float32)
    src = jax.random.randint(k_src, (N_EDGES,), 0, N_NODES, jnp.int32)
    dst = jax.random.randint(k_dst, (N_EDGES,), 0, N_NODES, jnp.int32)

    params = make_params(k_params, NODE_FEATURES, EDGE_FEATURES)

    out = cgcnn_conv_full(node_feats, edge_feats, src, dst, params)
    out = jax.block_until_ready(out)

    ref = jax.block_until_ready(reference(node_feats, edge_feats, src, dst, params))
    # bf16 MXU operands + approx-reciprocal sigmoid -> looser tolerance vs f32 ref.
    np.testing.assert_allclose(np.asarray(out), np.asarray(ref), rtol=5e-2, atol=1e-1)

    print("KERNEL_OK")
</pallas_src>

<mosaic_0001>
module attributes {stable_mosaic.version = 11 : i64} {
  func.func @_message_kernel(%arg0: i32, %arg1: memref<400x1xi32, #tpu.memory_space<vmem>>, %arg2: memref<200x32xbf16, #tpu.memory_space<vmem>>, %arg3: memref<32x64xbf16, #tpu.memory_space<vmem>>, %arg4: memref<160x64xbf16, #tpu.memory_space<vmem>>, %arg5: memref<160x64xbf16, #tpu.memory_space<vmem>>, %arg6: memref<1x64xf32, #tpu.memory_space<vmem>>, %arg7: memref<1x64xf32, #tpu.memory_space<vmem>>, %arg8: memref<200x64xbf16, #tpu.memory_space<vmem>>) attributes {dimension_semantics = [#tpu.dimension_semantics<parallel>], iteration_bounds = array<i64: 1>, scalar_prefetch = 0 : i64, scratch_operands = 0 : i64, tpu.core_type = #tpu.core_type<tc>, window_params = [{transform_indices = @transform_0, window_bounds = array<i64: 400, 1>}, {transform_indices = @transform_1, window_bounds = array<i64: 200, 32>}, {pipeline_mode = #tpu.pipeline_mode<synchronous>, transform_indices = @transform_2, window_bounds = array<i64: 32, 64>}, {pipeline_mode = #tpu.pipeline_mode<synchronous>, transform_indices = @transform_3, window_bounds = array<i64: 160, 64>}, {pipeline_mode = #tpu.pipeline_mode<synchronous>, transform_indices = @transform_4, window_bounds = array<i64: 160, 64>}, {pipeline_mode = #tpu.pipeline_mode<synchronous>, transform_indices = @transform_5, window_bounds = array<i64: 1, 64>}, {pipeline_mode = #tpu.pipeline_mode<synchronous>, transform_indices = @transform_6, window_bounds = array<i64: 1, 64>}, {transform_indices = @transform_7, window_bounds = array<i64: 200, 64>}]} {
    %c0 = arith.constant 0 : index
    %c0_0 = arith.constant 0 : index
    %0 = vector.load %arg1[%c0, %c0_0] : memref<400x1xi32, #tpu.memory_space<vmem>>, vector<400x1xi32>
    %1 = tpu.iota {dimensions = array<i32: 1>} : vector<400x32xi32>
    %2 = vector.broadcast %0 : vector<400x1xi32> to vector<400x32xi32>
    %3 = arith.cmpi eq, %2, %1 : vector<400x32xi32>
    %4 = arith.extui %3 : vector<400x32xi1> to vector<400x32xi32>
    %5 = arith.sitofp %4 : vector<400x32xi32> to vector<400x32xf32>
    %6 = arith.truncf %5 : vector<400x32xf32> to vector<400x32xbf16>
    %c0_1 = arith.constant 0 : index
    %c0_2 = arith.constant 0 : index
    %7 = vector.load %arg3[%c0_1, %c0_2] : memref<32x64xbf16, #tpu.memory_space<vmem>>, vector<32x64xbf16>
    %cst = arith.constant dense<0.000000e+00> : vector<400x64xf32>
    %8 = tpu.matmul %6, %7, %cst {dimension_numbers = #tpu.dot_dimension_numbers<[1], [0], [0], [1], [0, 0, 1, 1], [], []>} : vector<400x32xbf16>, vector<32x64xbf16>, vector<400x64xf32> -> vector<400x64xf32>
    %9 = vector.extract_strided_slice %8 {offsets = [0, 0], sizes = [200, 64], strides = [1, 1]} : vector<400x64xf32> to vector<200x64xf32>
    %10 = arith.truncf %9 : vector<200x64xf32> to vector<200x64xbf16>
    %11 = vector.extract_strided_slice %8 {offsets = [200, 0], sizes = [200, 64], strides = [1, 1]} : vector<400x64xf32> to vector<200x64xf32>
    %12 = arith.truncf %11 : vector<200x64xf32> to vector<200x64xbf16>
    %c0_3 = arith.constant 0 : index
    %c0_4 = arith.constant 0 : index
    %13 = vector.load %arg2[%c0_3, %c0_4] : memref<200x32xbf16, #tpu.memory_space<vmem>>, vector<200x32xbf16>
    %14 = tpu.concatenate %10, %12, %13 in 1 : vector<200x64xbf16>, vector<200x64xbf16>, vector<200x32xbf16> -> vector<200x160xbf16>
    %c0_5 = arith.constant 0 : index
    %c0_6 = arith.constant 0 : index
    %15 = vector.load %arg4[%c0_5, %c0_6] : memref<160x64xbf16, #tpu.memory_space<vmem>>, vector<160x64xbf16>
    %cst_7 = arith.constant dense<0.000000e+00> : vector<200x64xf32>
    %16 = tpu.matmul %14, %15, %cst_7 {dimension_numbers = #tpu.dot_dimension_numbers<[1], [0], [0], [1], [0, 0, 1, 1], [], []>} : vector<200x160xbf16>, vector<160x64xbf16>, vector<200x64xf32> -> vector<200x64xf32>
    %c0_8 = arith.constant 0 : index
    %c0_9 = arith.constant 0 : index
    %17 = vector.load %arg6[%c0_8, %c0_9] : memref<1x64xf32, #tpu.memory_space<vmem>>, vector<1x64xf32>
    %18 = vector.broadcast %17 : vector<1x64xf32> to vector<200x64xf32>
    %19 = arith.addf %16, %18 : vector<200x64xf32>
    %c0_10 = arith.constant 0 : index
    %c0_11 = arith.constant 0 : index
    %20 = vector.load %arg5[%c0_10, %c0_11] : memref<160x64xbf16, #tpu.memory_space<vmem>>, vector<160x64xbf16>
    %cst_12 = arith.constant dense<0.000000e+00> : vector<200x64xf32>
    %21 = tpu.matmul %14, %20, %cst_12 {dimension_numbers = #tpu.dot_dimension_numbers<[1], [0], [0], [1], [0, 0, 1, 1], [], []>} : vector<200x160xbf16>, vector<160x64xbf16>, vector<200x64xf32> -> vector<200x64xf32>
    %c0_13 = arith.constant 0 : index
    %c0_14 = arith.constant 0 : index
    %22 = vector.load %arg7[%c0_13, %c0_14] : memref<1x64xf32, #tpu.memory_space<vmem>>, vector<1x64xf32>
    %23 = vector.broadcast %22 : vector<1x64xf32> to vector<200x64xf32>
    %24 = arith.addf %21, %23 : vector<200x64xf32>
    %cst_15 = arith.constant 0.000000e+00 : f32
    %25 = vector.broadcast %cst_15 : f32 to vector<200x64xf32>
    %26 = arith.subf %25, %19 : vector<200x64xf32>
    %27 = math.exp %26 : vector<200x64xf32>
    %cst_16 = arith.constant 1.000000e+00 : f32
    %28 = vector.broadcast %cst_16 : f32 to vector<200x64xf32>
    %29 = arith.addf %28, %27 : vector<200x64xf32>
    %30 = tpu.reciprocal %29 {approx = true} : vector<200x64xf32> -> vector<200x64xf32>
    %31 = math.absf %24 : vector<200x64xf32>
    %cst_17 = arith.constant 0.000000e+00 : f32
    %32 = vector.broadcast %cst_17 : f32 to vector<200x64xf32>
    %33 = arith.subf %32, %31 : vector<200x64xf32>
    %34 = math.exp %33 : vector<200x64xf32>
    %35 = math.log1p %34 : vector<200x64xf32>
    %cst_18 = arith.constant 0.000000e+00 : f32
    %36 = vector.broadcast %cst_18 : f32 to vector<200x64xf32>
    %37 = arith.maximumf %24, %36 : vector<200x64xf32>
    %38 = arith.addf %35, %37 : vector<200x64xf32>
    %39 = arith.mulf %30, %38 : vector<200x64xf32>
    %40 = arith.truncf %39 : vector<200x64xf32> to vector<200x64xbf16>
    %c0_19 = arith.constant 0 : index
    %c0_20 = arith.constant 0 : index
    %41 = vector.load %arg8[%c0_19, %c0_20] : memref<200x64xbf16, #tpu.memory_space<vmem>>, vector<200x64xbf16>
    tpu.vector_store %arg8[%c0_19, %c0_20], %40 {strides = array<i32>} : memref<200x64xbf16, #tpu.memory_space<vmem>>, vector<200x64xbf16>,
    return
  }
  func.func @transform_0(%arg0: i32) -> (i32, i32) {
    %c0_i32 = arith.constant 0 : i32
    %c0_i32_0 = arith.constant 0 : i32
    return %arg0, %c0_i32 : i32, i32
  }
  func.func @transform_1(%arg0: i32) -> (i32, i32) {
    %c0_i32 = arith.constant 0 : i32
    %c0_i32_0 = arith.constant 0 : i32
    return %arg0, %c0_i32 : i32, i32
  }
  func.func @transform_2(%arg0: i32) -> (i32, i32) {
    %c0_i32 = arith.constant 0 : i32
    %c0_i32_0 = arith.constant 0 : i32
    %c0_i32_1 = arith.constant 0 : i32
    return %c0_i32, %c0_i32_0 : i32, i32
  }
  func.func @transform_3(%arg0: i32) -> (i32, i32) {
    %c0_i32 = arith.constant 0 : i32
    %c0_i32_0 = arith.constant 0 : i32
    %c0_i32_1 = arith.constant 0 : i32
    return %c0_i32, %c0_i32_0 : i32, i32
  }
  func.func @transform_4(%arg0: i32) -> (i32, i32) {
    %c0_i32 = arith.constant 0 : i32
    %c0_i32_0 = arith.constant 0 : i32
    %c0_i32_1 = arith.constant 0 : i32
    return %c0_i32, %c0_i32_0 : i32, i32
  }
  func.func @transform_5(%arg0: i32) -> (i32, i32) {
    %c0_i32 = arith.constant 0 : i32
    %c0_i32_0 = arith.constant 0 : i32
    %c0_i32_1 = arith.constant 0 : i32
    return %c0_i32, %c0_i32_0 : i32, i32
  }
  func.func @transform_6(%arg0: i32) -> (i32, i32) {
    %c0_i32 = arith.constant 0 : i32
    %c0_i32_0 = arith.constant 0 : i32
    %c0_i32_1 = arith.constant 0 : i32
    return %c0_i32, %c0_i32_0 : i32, i32
  }
  func.func @transform_7(%arg0: i32) -> (i32, i32) {
    %c0_i32 = arith.constant 0 : i32
    %c0_i32_0 = arith.constant 0 : i32
    return %arg0, %c0_i32 : i32, i32
  }
}

</mosaic_0001>

<bundles_post_ra>
// kernel: tpu_custom_call.1
= control target key start
LH: loop header
LB: loop body
LE: loop exit
PB: predicated region body
PF: predicated region fallthrough
CT: control target
= control target key end

     0   :  { %v2536_v0 = vmov 0   ;;  %v77_v51 = vlaneseq  ;;  %v2537_v62 = vmov 0.0   ;;  %vm420_vm2 = vcmask 261120   ;;  %s2538_s22 = smov 64   ;;  %s3813_s0 = inlined_call_operand.vmem [shape: s32[400,1], index: 0, kind: input, shape index: {}]   ;;  %s3814_s2 = inlined_call_operand.vmem [shape: bf16[32,64], index: 2, kind: input, shape index: {}]   ;;  %s3815_s3 = inlined_call_operand.vmem [shape: bf16[160,64], index: 3, kind: input, shape index: {}]   ;;  %s3816_s1 = inlined_call_operand.vmem [shape: bf16[200,32], index: 1, kind: input, shape index: {}]   ;;  %s3817_s4 = inlined_call_operand.vmem [shape: bf16[160,64], index: 4, kind: input, shape index: {}]   ;;  %s3818_s5 = inlined_call_operand.vmem [shape: f32[1,64], index: 5, kind: input, shape index: {}]   ;;  %s3819_s6 = inlined_call_operand.vmem [shape: f32[1,64], index: 6, kind: input, shape index: {}]   ;;  %s3820_s7 = inlined_call_operand.vmem [shape: bf16[200,64], index: 7, kind: output, shape index: {}]  }
   0x1   :  { %2332 = vset.pattern.permute.xlu2 %v2536_v0  ;;  %2331 = vset.pattern.permute.xlu1 %v2536_v0  ;;  %v31_v1 = vld [vmem:[%s3813_s0 + $0x20] sm:$0xff]  ;;  %v29_v2 = vld [vmem:[%s3813_s0 + $0x10] sm:$0xff]  ;;  %v32_v4 = vld [vmem:[%s3813_s0 + $0x28] sm:$0xff] }
   0x2   :  { %v27_v3 = vld [vmem:[%s3813_s0] sm:$0xff]  ;;  %2330 = vset.pattern.permute.xlu0 %v2536_v0  ;;  %92 = vperm.xlu2 %2332, %v31_v1   ;;  %v30_v5 = vld [vmem:[%s3813_s0 + $0x18] sm:$0xff]  ;;  %v28_v6 = vld [vmem:[%s3813_s0 + $0x8] sm:$0xff]  ;;  %v2729_v56 = vand.u32 127, %v77_v51 }
   0x3   :  { %86 = vperm.xlu1 %2331, %v29_v2   ;;  %80 = vperm.xlu0 %2330, %v27_v3   ;;  %v35_v7 = vld [vmem:[%s3813_s0 + $0x40] sm:$0xff]  ;;  %v34_v8 = vld [vmem:[%s3813_s0 + $0x38] sm:$0xff]  ;;  %v33_v9 = vld [vmem:[%s3813_s0 + $0x30] sm:$0xff] }
   0x4   :  { %v38_v10 = vld [vmem:[%s3813_s0 + $0x58] sm:$0xff]  ;;  %v37_v11 = vld [vmem:[%s3813_s0 + $0x50] sm:$0xff]  ;;  %v36_v12 = vld [vmem:[%s3813_s0 + $0x48] sm:$0xff] }
   0x5   :  { %v41_v13 = vld [vmem:[%s3813_s0 + $0x70] sm:$0xff]  ;;  %v40_v14 = vld [vmem:[%s3813_s0 + $0x68] sm:$0xff]  ;;  %v39_v15 = vld [vmem:[%s3813_s0 + $0x60] sm:$0xff] }
   0x6   :  { %v44_v16 = vld [vmem:[%s3813_s0 + $0x88] sm:$0xff]  ;;  %v43_v17 = vld [vmem:[%s3813_s0 + $0x80] sm:$0xff]  ;;  %v42_v18 = vld [vmem:[%s3813_s0 + $0x78] sm:$0xff] }
   0x7   :  { %v47_v19 = vld [vmem:[%s3813_s0 + $0xa0] sm:$0xff]  ;;  %v46_v20 = vld [vmem:[%s3813_s0 + $0x98] sm:$0xff]  ;;  %v45_v21 = vld [vmem:[%s3813_s0 + $0x90] sm:$0xff] }
   0x8   :  { %v50_v22 = vld [vmem:[%s3813_s0 + $0xb8] sm:$0xff]  ;;  %v49_v23 = vld [vmem:[%s3813_s0 + $0xb0] sm:$0xff]  ;;  %v48_v24 = vld [vmem:[%s3813_s0 + $0xa8] sm:$0xff] }
   0x9   :  { %v53_v25 = vld [vmem:[%s3813_s0 + $0xd0] sm:$0xff]  ;;  %v52_v26 = vld [vmem:[%s3813_s0 + $0xc8] sm:$0xff]  ;;  %v51_v27 = vld [vmem:[%s3813_s0 + $0xc0] sm:$0xff] }
   0xa   :  { %95 = vperm.xlu2 %2332, %v32_v4   ;;  %v56_v28 = vld [vmem:[%s3813_s0 + $0xe8] sm:$0xff]  ;;  %v55_v29 = vld [vmem:[%s3813_s0 + $0xe0] sm:$0xff]  ;;  %v54_v30 = vld [vmem:[%s3813_s0 + $0xd8] sm:$0xff] }
   0xb   :  { %89 = vperm.xlu1 %2331, %v30_v5   ;;  %83 = vperm.xlu0 %2330, %v28_v6   ;;  %v59_v31 = vld [vmem:[%s3813_s0 + $0x100] sm:$0xff]  ;;  %v58_v32 = vld [vmem:[%s3813_s0 + $0xf8] sm:$0xff]  ;;  %v57_v33 = vld [vmem:[%s3813_s0 + $0xf0] sm:$0xff] }
   0xc   :  { %v62_v34 = vld [vmem:[%s3813_s0 + $0x118] sm:$0xff]  ;;  %v2290_v35 = vld [vmem:[%s3814_s2 + $0x8] sm:$0xff]  ;;  %v61_v36 = vld [vmem:[%s3813_s0 + $0x110] sm:$0xff] }
   0xd   :  { %v60_v37 = vld [vmem:[%s3813_s0 + $0x108] sm:$0xff]  ;;  %502 = vmatpush.bf16.msra.mxu0 %v2290_v35  ;;  %2323 = vmatpush.bf16.msra.mxu3 %v2290_v35  ;;  %v2289_v39 = vld [vmem:[%s3814_s2] sm:$0xff]  ;;  %v65_v40 = vld [vmem:[%s3813_s0 + $0x130] sm:$0xff] }
   0xe   :  { %v64_v41 = vld [vmem:[%s3813_s0 + $0x128] sm:$0xff]  ;;  %v63_v42 = vld [vmem:[%s3813_s0 + $0x120] sm:$0xff]  ;;  %v66_v46 = vld [vmem:[%s3813_s0 + $0x138] sm:$0xff] }
   0xf   :  { %v68_v44 = vld [vmem:[%s3813_s0 + $0x148] sm:$0xff]  ;;  %v67_v45 = vld [vmem:[%s3813_s0 + $0x140] sm:$0xff]  ;;  %v70_v49 = vld [vmem:[%s3813_s0 + $0x158] sm:$0xff] }
  0x10   :  { %v71_v48 = vld [vmem:[%s3813_s0 + $0x160] sm:$0xff]  ;;  %v69_v50 = vld [vmem:[%s3813_s0 + $0x150] sm:$0xff]  ;;  %v74_v55 = vld [vmem:[%s3813_s0 + $0x178] sm:$0xff] }
  0x11   :  { %503 = vmatpush.bf16.msra.mxu0 %v2289_v39  ;;  %2324 = vmatpush.bf16.msra.mxu3 %v2289_v39  ;;  %v73_v57 = vld [vmem:[%s3813_s0 + $0x170] sm:$0xff]  ;;  %v72_v58 = vld [vmem:[%s3813_s0 + $0x168] sm:$0xff]  ;;  %v75_v3 = vld [vmem:[%s3813_s0 + $0x180] sm:$0xff] }
  0x12   :  { %104 = vperm.xlu2 %2332, %v35_v7   ;;  %v76_v2 = vld [vmem:[%s3813_s0 + $0x188] sm:$0xff] }
  0x13   :  { %101 = vperm.xlu1 %2331, %v34_v8   ;;  %98 = vperm.xlu0 %2330, %v33_v9  }
  0x1a   :  { %113 = vperm.xlu2 %2332, %v38_v10  }
  0x1b   :  { %110 = vperm.xlu1 %2331, %v37_v11   ;;  %107 = vperm.xlu0 %2330, %v36_v12  }
  0x22   :  { %122 = vperm.xlu2 %2332, %v41_v13  }
  0x23   :  { %119 = vperm.xlu1 %2331, %v40_v14   ;;  %116 = vperm.xlu0 %2330, %v39_v15  }
  0x2a   :  { %131 = vperm.xlu2 %2332, %v44_v16  }
  0x2b   :  { %128 = vperm.xlu1 %2331, %v43_v17   ;;  %125 = vperm.xlu0 %2330, %v42_v18  }
  0x32   :  { %140 = vperm.xlu2 %2332, %v47_v19  }
  0x33   :  { %137 = vperm.xlu1 %2331, %v46_v20   ;;  %134 = vperm.xlu0 %2330, %v45_v21  }
  0x3a   :  { %149 = vperm.xlu2 %2332, %v50_v22  }
  0x3b   :  { %146 = vperm.xlu1 %2331, %v49_v23   ;;  %143 = vperm.xlu0 %2330, %v48_v24  }
  0x42   :  { %158 = vperm.xlu2 %2332, %v53_v25  }
  0x43   :  { %155 = vperm.xlu1 %2331, %v52_v26   ;;  %152 = vperm.xlu0 %2330, %v51_v27  }
  0x4a   :  { %167 = vperm.xlu2 %2332, %v56_v28  }
  0x4b   :  { %164 = vperm.xlu1 %2331, %v55_v29   ;;  %161 = vperm.xlu0 %2330, %v54_v30  }
  0x52   :  { %176 = vperm.xlu2 %2332, %v59_v31  }
  0x53   :  { %173 = vperm.xlu1 %2331, %v58_v32   ;;  %170 = vperm.xlu0 %2330, %v57_v33  }
  0x5a   :  { %185 = vperm.xlu2 %2332, %v62_v34  }
  0x5b   :  { %182 = vperm.xlu1 %2331, %v61_v36   ;;  %179 = vperm.xlu0 %2330, %v60_v37  }
  0x5c   :  { %v2690_v38 = vpop.permute.xlu2 %92 }
  0x5d   :  { %vm233_vm9 = vcmp.eq.s32.totalorder %v2690_v38, %v2729_v56 }
  0x5e   :  { %v2056_v22 = vsel %vm233_vm9, 1.0, %v2537_v62 }
  0x62   :  { %194 = vperm.xlu2 %2332, %v65_v40  }
  0x63   :  { %191 = vperm.xlu1 %2331, %v64_v41   ;;  %188 = vperm.xlu0 %2330, %v63_v42  }
  0x64   :  { %v2704_v43 = vpop.permute.xlu2 %95 }
  0x65   :  { %vm234_vm10 = vcmp.eq.s32.totalorder %v2704_v43, %v2729_v56 }
  0x66   :  { %v2057_v23 = vsel %vm234_vm10, 1.0, %v2537_v62 }
  0x67   :  { %v381_v30 = vpack.c.bf16 %v2057_v23, %v2056_v22 }
  0x6a   :  { %203 = vperm.xlu2 %2332, %v68_v44  }
  0x6b   :  { %200 = vperm.xlu1 %2331, %v67_v45   ;;  %197 = vperm.xlu0 %2330, %v66_v46  }
  0x6c   :  { %v2715_v47 = vpop.permute.xlu2 %104 }
  0x6d   :  { %vm237_vm10 = vcmp.eq.s32.totalorder %v2715_v47, %v2729_v56 }
  0x72   :  { %212 = vperm.xlu2 %2332, %v71_v48  }
  0x73   :  { %209 = vperm.xlu1 %2331, %v70_v49   ;;  %206 = vperm.xlu0 %2330, %v69_v50  }
  0x74   :  { %v114_v52 = vpop.permute.xlu2 %113 }
  0x75   :  { %v87_v53 = vpop.permute.xlu1 %86  ;;  %v81_v54 = vpop.permute.xlu0 %80  ;;  %vm240_vm3 = vcmp.eq.s32.totalorder %v114_v52, %v2729_v56 }
  0x76   :  { %vm229_vm0 = vcmp.eq.s32.totalorder %v81_v54, %v2729_v56  ;;  %vm231_vm4 = vcmp.eq.s32.totalorder %v87_v53, %v2729_v56  ;;  %v2752_v7 = vsel %vm240_vm3, 1.0, %v2537_v62 }
  0x77   :  { %v2052_v63 = vsel %vm229_vm0, 1.0, %v2537_v62  ;;  %v2054_v8 = vsel %vm231_vm4, 1.0, %v2537_v62 }
  0x7a   :  { %221 = vperm.xlu2 %2332, %v74_v55  }
  0x7b   :  { %218 = vperm.xlu1 %2331, %v73_v57   ;;  %215 = vperm.xlu0 %2330, %v72_v58  }
  0x7c   :  { %v123_v61 = vpop.permute.xlu2 %122 }
  0x7d   :  { %v90_v59 = vpop.permute.xlu1 %89  ;;  %v84_v60 = vpop.permute.xlu0 %83  ;;  %vm243_vm11 = vcmp.eq.s32.totalorder %v123_v61, %v2729_v56 }
  0x7e   :  { %vm230_vm1 = vcmp.eq.s32.totalorder %v84_v60, %v2729_v56  ;;  %vm232_vm5 = vcmp.eq.s32.totalorder %v90_v59, %v2729_v56  ;;  %v2786_v26 = vsel %vm243_vm11, 1.0, %v2537_v62  ;;  %v2060_v59 = vsel %vm237_vm10, 1.0, %v2537_v62 }
  0x7f   :  { %v2053_v0 = vsel %vm230_vm1, 1.0, %v2537_v62  ;;  %v2055_v9 = vsel %vm232_vm5, 1.0, %v2537_v62 }
  0x80   :  { %v379_v1 = vpack.c.bf16 %v2053_v0, %v2052_v63  ;;  %v380_v13 = vpack.c.bf16 %v2055_v9, %v2054_v8 }
  0x82   :  { %2110 = vmatmul.msk.bf16.vlgmr.msra.gmra.mxu0 %vm420_vm2, %v379_v1 }
  0x83   :  { %227 = vperm.xlu1 %2331, %v76_v2   ;;  %224 = vperm.xlu0 %2330, %v75_v3  }
  0x84   :  { %v132_v6 = vpop.permute.xlu2 %131 }
  0x85   :  { %v102_v4 = vpop.permute.xlu1 %101  ;;  %v99_v5 = vpop.permute.xlu0 %98  ;;  %vm246_vm12 = vcmp.eq.s32.totalorder %v132_v6, %v2729_v56 }
  0x86   :  { %v2789_v27 = vsel %vm246_vm12, 1.0, %v2537_v62  ;;  %vm236_vm1 = vcmp.eq.s32.totalorder %v102_v4, %v2729_v56  ;;  %vm235_vm3 = vcmp.eq.s32.totalorder %v99_v5, %v2729_v56 }
  0x87   :  { %v2059_v39 = vsel %vm236_vm1, 1.0, %v2537_v62  ;;  %v2058_v40 = vsel %vm235_vm3, 1.0, %v2537_v62 }
  0x88   :  { %v382_v48 = vpack.c.bf16 %v2059_v39, %v2058_v40 }
  0x8c   :  { %v141_v15 = vpop.permute.xlu2 %140 }
  0x8d   :  { %v111_v10 = vpop.permute.xlu1 %110  ;;  %v2756_v11 = vpop.permute.xlu0 %107  ;;  %vm249_vm4 = vcmp.eq.s32.totalorder %v141_v15, %v2729_v56 }
  0x8e   :  { %vm239_vm6 = vcmp.eq.s32.totalorder %v111_v10, %v2729_v56  ;;  %v2821_v43 = vsel %vm249_vm4, 1.0, %v2537_v62  ;;  %vm238_vm11 = vcmp.eq.s32.totalorder %v2756_v11, %v2729_v56 }
  0x8f   :  { %v2760_v12 = vsel %vm239_vm6, 1.0, %v2537_v62  ;;  %v2061_v60 = vsel %vm238_vm11, 1.0, %v2537_v62 }
  0x90   :  { %v384_v14 = vpack.c.bf16 %v2752_v7, %v2760_v12  ;;  %v383_v3 = vpack.c.bf16 %v2061_v60, %v2060_v59 }
  0x92   :  { %2111 = vmatmul.msk.bf16.gmra.mxu0 %vm420_vm2, %v380_v13 }
  0x94   :  { %v150_v21 = vpop.permute.xlu2 %149 }
  0x95   :  { %v120_v16 = vpop.permute.xlu1 %119  ;;  %v117_v17 = vpop.permute.xlu0 %116  ;;  %vm252_vm5 = vcmp.eq.s32.totalorder %v150_v21, %v2729_v56 }
  0x96   :  { %vm242_vm7 = vcmp.eq.s32.totalorder %v120_v16, %v2729_v56  ;;  %vm241_vm8 = vcmp.eq.s32.totalorder %v117_v17, %v2729_v56  ;;  %v2824_v44 = vsel %vm252_vm5, 1.0, %v2537_v62 }
  0x97   :  { %v2768_v18 = vsel %vm242_vm7, 1.0, %v2537_v62  ;;  %v2771_v19 = vsel %vm241_vm8, 1.0, %v2537_v62 }
  0x98   :  { %v385_v20 = vpack.c.bf16 %v2768_v18, %v2771_v19 }
  0x9c   :  { %v159_v35 = vpop.permute.xlu2 %158 }
  0x9d   :  { %v129_v24 = vpop.permute.xlu1 %128  ;;  %v126_v25 = vpop.permute.xlu0 %125  ;;  %vm255_vm12 = vcmp.eq.s32.totalorder %v159_v35, %v2729_v56 }
  0x9e   :  { %vm245_vm13 = vcmp.eq.s32.totalorder %v129_v24, %v2729_v56  ;;  %vm244_vm14 = vcmp.eq.s32.totalorder %v126_v25, %v2729_v56  ;;  %v2858_v47 = vsel %vm255_vm12, 1.0, %v2537_v62 }
  0x9f   :  { %v2792_v28 = vsel %vm245_vm13, 1.0, %v2537_v62  ;;  %v2795_v29 = vsel %vm244_vm14, 1.0, %v2537_v62 }
  0xa0   :  { %v387_v31 = vpack.c.bf16 %v2789_v27, %v2792_v28  ;;  %v386_v32 = vpack.c.bf16 %v2795_v29, %v2786_v26 }
  0xa2   :  { %2112 = vmatmul.msk.bf16.gmra.mxu0 %vm420_vm2, %v381_v30 }
  0xa4   :  { %v168_v49 = vpop.permute.xlu2 %167 }
  0xa5   :  { %v138_v33 = vpop.permute.xlu1 %137  ;;  %v135_v34 = vpop.permute.xlu0 %134  ;;  %vm258_vm13 = vcmp.eq.s32.totalorder %v168_v49, %v2729_v56 }
  0xa6   :  { %vm248_vm15 = vcmp.eq.s32.totalorder %v138_v33, %v2729_v56  ;;  %vm247_vm0 = vcmp.eq.s32.totalorder %v135_v34, %v2729_v56  ;;  %v2861_v0 = vsel %vm258_vm13, 1.0, %v2537_v62 }
  0xa7   :  { %v2805_v36 = vsel %vm248_vm15, 1.0, %v2537_v62  ;;  %v2808_v37 = vsel %vm247_vm0, 1.0, %v2537_v62 }
  0xa8   :  { %v388_v38 = vpack.c.bf16 %v2805_v36, %v2808_v37 }
  0xac   :  { %v177_v58 = vpop.permute.xlu2 %176 }
  0xad   :  { %v147_v41 = vpop.permute.xlu1 %146  ;;  %v144_v42 = vpop.permute.xlu0 %143  ;;  %vm261_vm3 = vcmp.eq.s32.totalorder %v177_v58, %v2729_v56 }
  0xae   :  { %vm251_vm6 = vcmp.eq.s32.totalorder %v147_v41, %v2729_v56  ;;  %vm250_vm7 = vcmp.eq.s32.totalorder %v144_v42, %v2729_v56  ;;  %v2889_v17 = vsel %vm261_vm3, 1.0, %v2537_v62 }
  0xaf   :  { %v2827_v45 = vsel %vm251_vm6, 1.0, %v2537_v62  ;;  %v2830_v46 = vsel %vm250_vm7, 1.0, %v2537_v62 }
  0xb0   :  { %v390_v50 = vpack.c.bf16 %v2824_v44, %v2827_v45  ;;  %v389_v51 = vpack.c.bf16 %v2830_v46, %v2821_v43 }
  0xb2   :  { %2113 = vmatmul.msk.bf16.gmra.mxu0 %vm420_vm2, %v382_v48 }
  0xb4   :  { %v186_v6 = vpop.permute.xlu2 %185 }
  0xb5   :  { %v156_v52 = vpop.permute.xlu1 %155  ;;  %v153_v53 = vpop.permute.xlu0 %152  ;;  %vm264_vm4 = vcmp.eq.s32.totalorder %v186_v6, %v2729_v56 }
  0xb6   :  { %vm254_vm8 = vcmp.eq.s32.totalorder %v156_v52, %v2729_v56  ;;  %vm253_vm9 = vcmp.eq.s32.totalorder %v153_v53, %v2729_v56  ;;  %v2892_v21 = vsel %vm264_vm4, 1.0, %v2537_v62 }
  0xb7   :  { %v2840_v54 = vsel %vm254_vm8, 1.0, %v2537_v62  ;;  %v2843_v55 = vsel %vm253_vm9, 1.0, %v2537_v62 }
  0xb8   :  { %v391_v57 = vpack.c.bf16 %v2840_v54, %v2843_v55 }
  0xbc   :  { %v195_v22 = vpop.permute.xlu2 %194 }
  0xbd   :  { %v165_v61 = vpop.permute.xlu1 %164  ;;  %v162_v63 = vpop.permute.xlu0 %161  ;;  %vm267_vm9 = vcmp.eq.s32.totalorder %v195_v22, %v2729_v56 }
  0xbe   :  { %vm257_vm14 = vcmp.eq.s32.totalorder %v165_v61, %v2729_v56  ;;  %vm256_vm15 = vcmp.eq.s32.totalorder %v162_v63, %v2729_v56 }
  0xbf   :  { %v2864_v1 = vsel %vm257_vm14, 1.0, %v2537_v62  ;;  %v2867_v2 = vsel %vm256_vm15, 1.0, %v2537_v62 }
  0xc0   :  { %v393_v4 = vpack.c.bf16 %v2861_v0, %v2864_v1  ;;  %v392_v5 = vpack.c.bf16 %v2867_v2, %v2858_v47 }
  0xc2   :  { %2114 = vmatmul.msk.bf16.gmra.mxu0 %vm420_vm2, %v383_v3 }
  0xc4   :  { %v204_v41 = vpop.permute.xlu2 %203 }
  0xc5   :  { %v174_v8 = vpop.permute.xlu1 %173  ;;  %v171_v9 = vpop.permute.xlu0 %170  ;;  %vm270_vm10 = vcmp.eq.s32.totalorder %v204_v41, %v2729_v56 }
  0xc6   :  { %vm260_vm0 = vcmp.eq.s32.totalorder %v174_v8, %v2729_v56  ;;  %vm259_vm1 = vcmp.eq.s32.totalorder %v171_v9, %v2729_v56  ;;  %v2093_v42 = vsel %vm270_vm10, 1.0, %v2537_v62 }
  0xc7   :  { %v2877_v10 = vsel %vm260_vm0, 1.0, %v2537_v62  ;;  %v2880_v11 = vsel %vm259_vm1, 1.0, %v2537_v62 }
  0xc8   :  { %v394_v13 = vpack.c.bf16 %v2877_v10, %v2880_v11 }
  0xcc   :  { %v213_v19 = vpop.permute.xlu2 %212 }
  0xcd   :  { %v183_v15 = vpop.permute.xlu1 %182  ;;  %v180_v16 = vpop.permute.xlu0 %179  ;;  %vm273_vm0 = vcmp.eq.s32.totalorder %v213_v19, %v2729_v56 }
  0xce   :  { %vm263_vm5 = vcmp.eq.s32.totalorder %v183_v15, %v2729_v56  ;;  %vm262_vm6 = vcmp.eq.s32.totalorder %v180_v16, %v2729_v56  ;;  %v2096_v3 = vsel %vm273_vm0, 1.0, %v2537_v62 }
  0xcf   :  { %v2895_v23 = vsel %vm263_vm5, 1.0, %v2537_v62  ;;  %v2898_v24 = vsel %vm262_vm6, 1.0, %v2537_v62  ;;  %vm920_vm6 = vcmask 523264  }
  0xd0   :  { %v396_v25 = vpack.c.bf16 %v2892_v21, %v2895_v23  ;;  %v395_v30 = vpack.c.bf16 %v2898_v24, %v2889_v17  ;;  %v3070_v23 = vld [vmem:[%s3815_s3 + $0x40] sm:$0xff] }
  0xd2   :  { %2115 = vmatmul.msk.bf16.gmra.mxu0 %vm420_vm2, %v384_v14  ;;  %v2923_v14 = vsel %vm267_vm9, 1.0, %v2537_v62 }
  0xd4   :  { %v222_v15 = vpop.permute.xlu2 %221 }
  0xd5   :  { %v192_v33 = vpop.permute.xlu1 %191  ;;  %v189_v34 = vpop.permute.xlu0 %188  ;;  %vm276_vm3 = vcmp.eq.s32.totalorder %v222_v15, %v2729_v56 }
  0xd6   :  { %vm266_vm7 = vcmp.eq.s32.totalorder %v192_v33, %v2729_v56  ;;  %vm265_vm8 = vcmp.eq.s32.totalorder %v189_v34, %v2729_v56 }
  0xd7   :  { %v2911_v35 = vsel %vm266_vm7, 1.0, %v2537_v62  ;;  %v2914_v39 = vsel %vm265_vm8, 1.0, %v2537_v62  ;;  %vm2022_vm8 = vcmask 519168  }
  0xd8   :  { %v397_v40 = vpack.c.bf16 %v2911_v35, %v2914_v39 }
  0xdd   :  { %v201_v7 = vpop.permute.xlu1 %200  ;;  %v198_v12 = vpop.permute.xlu0 %197 }
  0xde   :  { %vm269_vm11 = vcmp.eq.s32.totalorder %v201_v7, %v2729_v56  ;;  %vm268_vm12 = vcmp.eq.s32.totalorder %v198_v12, %v2729_v56 }
  0xdf   :  { %v2092_v48 = vsel %vm269_vm11, 1.0, %v2537_v62  ;;  %v2928_v49 = vsel %vm268_vm12, 1.0, %v2537_v62 }
  0xe0   :  { %v399_v52 = vpack.c.bf16 %v2093_v42, %v2092_v48  ;;  %v398_v53 = vpack.c.bf16 %v2928_v49, %v2923_v14 }
  0xe2   :  { %2116 = vmatmul.msk.bf16.gmra.mxu0 %vm420_vm2, %v385_v20  ;;  %2130 = vmatmul.msk.bf16.vlgmr.msra.gmra.mxu3 %vm420_vm2, %v399_v52 }
  0xe5   :  { %v210_v58 = vpop.permute.xlu1 %209  ;;  %v207_v59 = vpop.permute.xlu0 %206 }
  0xe6   :  { %vm272_vm13 = vcmp.eq.s32.totalorder %v210_v58, %v2729_v56  ;;  %vm271_vm14 = vcmp.eq.s32.totalorder %v207_v59, %v2729_v56 }
  0xe7   :  { %v2095_v60 = vsel %vm272_vm13, 1.0, %v2537_v62  ;;  %v2094_v61 = vsel %vm271_vm14, 1.0, %v2537_v62 }
  0xe8   :  { %v400_v63 = vpack.c.bf16 %v2095_v60, %v2094_v61 }
  0xed   :  { %v216_v18 = vpop.permute.xlu0 %215  ;;  %v219_v29 = vpop.permute.xlu1 %218 }
  0xee   :  { %vm274_vm15 = vcmp.eq.s32.totalorder %v216_v18, %v2729_v56  ;;  %vm275_vm1 = vcmp.eq.s32.totalorder %v219_v29, %v2729_v56 }
  0xef   :  { %v2097_v20 = vsel %vm274_vm15, 1.0, %v2537_v62  ;;  %v2098_v28 = vsel %vm275_vm1, 1.0, %v2537_v62 }
  0xf0   :  { %v401_v8 = vpack.c.bf16 %v2097_v20, %v2096_v3 }
  0xf2   :  { %2117 = vmatmul.msk.bf16.gmra.mxu0 %vm420_vm2, %v386_v32  ;;  %2131 = vmatmul.msk.bf16.gmra.mxu3 %vm420_vm2, %v400_v63 }
  0xf5   :  { %v228_v41 = vpop.permute.xlu1 %227  ;;  %v225_v12 = vpop.permute.xlu0 %224 }
  0xf6   :  { %vm278_vm4 = vcmp.eq.s32.totalorder %v228_v41, %v2729_v56  ;;  %vm277_vm5 = vcmp.eq.s32.totalorder %v225_v12, %v2729_v56 }
  0xf7   :  { %v2101_v37 = vsel %vm278_vm4, 1.0, %v2537_v62 }
  0xff   :  { %v505_v6 = vpop.f32.mrf.mxu0 }
 0x100   :  { %v630_v26 = vpack.c.bf16 %v505_v6, %v505_v6 }
 0x102   :  { %2118 = vmatmul.msk.bf16.gmra.mxu0 %vm420_vm2, %v387_v31  ;;  %2132 = vmatmul.msk.bf16.gmra.mxu3 %vm420_vm2, %v401_v8  ;;  %v2956_v16 = vunpack.c.l.b16 %v630_v26  ;;  %v2099_v31 = vsel %vm276_vm3, 1.0, %v2537_v62 }
 0x103   :  { %v402_v34 = vpack.c.bf16 %v2099_v31, %v2098_v28 }
 0x107   :  { %v507_v32 = vpop.f32.mrf.mxu0 }
 0x108   :  { %v631_v9 = vpack.c.bf16 %v507_v32, %v507_v32 }
 0x10a   :  { %v2958_v22 = vunpack.c.l.b16 %v631_v9 }
 0x10c   :  { %v755_v27 = vpack.c.b16 %v2958_v22, %v2956_v16 }
 0x10f   :  { %v510_v33 = vpop.f32.mrf.mxu0 }
 0x110   :  { %v632_v7 = vpack.c.bf16 %v510_v33, %v510_v33 }
 0x112   :  { %2119 = vmatmul.msk.bf16.gmra.mxu0 %vm420_vm2, %v388_v38  ;;  %2133 = vmatmul.msk.bf16.gmra.mxu3 %vm420_vm2, %v402_v34  ;;  %v2972_v52 = vunpack.c.l.b16 %v632_v7  ;;  %v2100_v38 = vsel %vm277_vm5, 1.0, %v2537_v62 }
 0x113   :  { %v403_v60 = vpack.c.bf16 %v2101_v37, %v2100_v38 }
 0x117   :  { %v512_v42 = vpop.f32.mrf.mxu0 }
 0x118   :  { %v633_v48 = vpack.c.bf16 %v512_v42, %v512_v42 }
 0x11a   :  { %v2974_v58 = vunpack.c.l.b16 %v633_v48 }
 0x11c   :  { %v756_v36 = vpack.c.b16 %v2974_v58, %v2972_v52  ;;  %v3298_v58 = vld [vmem:[%s3816_s1 + $0x20] sm:$0xff] }
 0x11f   :  { %v515_v59 = vpop.f32.mrf.mxu0 }
 0x120   :  { %v634_v56 = vpack.c.bf16 %v515_v59, %v515_v59 }
 0x122   :  { %2120 = vmatmul.msk.bf16.gmra.mxu0 %vm420_vm2, %v389_v51  ;;  %2134 = vmatmul.msk.bf16.gmra.mxu3 %vm420_vm2, %v403_v60  ;;  %v2985_v18 = vunpack.c.l.b16 %v634_v56 }
 0x127   :  { %v517_v61 = vpop.f32.mrf.mxu0 }
 0x128   :  { %v635_v63 = vpack.c.bf16 %v517_v61, %v517_v61 }
 0x12a   :  { %v2987_v19 = vunpack.c.l.b16 %v635_v63 }
 0x12c   :  { %v757_v20 = vpack.c.b16 %v2987_v19, %v2985_v18  ;;  %v3313_v19 = vld [vmem:[%s3816_s1 + $0x28] sm:$0xff] }
 0x12f   :  { %v520_v62 = vpop.f32.mrf.mxu0 }
 0x130   :  { %v636_v43 = vpack.c.bf16 %v520_v62, %v520_v62 }
 0x132   :  { %2121 = vmatmul.msk.bf16.gmra.mxu0 %vm420_vm2, %v390_v50  ;;  %v2995_v3 = vunpack.c.l.b16 %v636_v43 }
 0x137   :  { %v522_v46 = vpop.f32.mrf.mxu0 }
 0x138   :  { %v637_v51 = vpack.c.bf16 %v522_v46, %v522_v46  ;;  %v3062_v46 = vld [vmem:[%s3815_s3 + $0x48] sm:$0xff] }
 0x139   :  { %2325 = vmatpush.bf16.msra.mxu2 %v3062_v46 }
 0x13a   :  { %v2997_v6 = vunpack.c.l.b16 %v637_v51 }
 0x13c   :  { %v758_v8 = vpack.c.b16 %v2997_v6, %v2995_v3 }
 0x13d   :  { %2326 = vmatpush.bf16.msra.mxu2 %v3070_v23 }
 0x13f   :  { %v525_v26 = vpop.f32.mrf.mxu0 }
 0x140   :  { %v638_v29 = vpack.c.bf16 %v525_v26, %v525_v26 }
 0x142   :  { %2122 = vmatmul.msk.bf16.gmra.mxu0 %vm420_vm2, %v391_v57  ;;  %v3005_v50 = vunpack.c.l.b16 %v638_v29 }
 0x147   :  { %v527_v44 = vpop.f32.mrf.mxu0 }
 0x148   :  { %v639_v45 = vpack.c.bf16 %v527_v44, %v527_v44 }
 0x14a   :  { %v3007_v32 = vunpack.c.l.b16 %v639_v45 }
 0x14c   :  { %v759_v9 = vpack.c.b16 %v3007_v32, %v3005_v50 }
 0x14f   :  { %v530_v15 = vpop.f32.mrf.mxu0 }
 0x150   :  { %v640_v28 = vpack.c.bf16 %v530_v15, %v530_v15 }
 0x152   :  { %2123 = vmatmul.msk.bf16.gmra.mxu0 %vm420_vm2, %v392_v5  ;;  %v3015_v57 = vunpack.c.l.b16 %v640_v28 }
 0x157   :  { %v532_v54 = vpop.f32.mrf.mxu0 }
 0x158   :  { %v641_v55 = vpack.c.bf16 %v532_v54, %v532_v54 }
 0x15a   :  { %v3017_v31 = vunpack.c.l.b16 %v641_v55 }
 0x15c   :  { %v760_v33 = vpack.c.b16 %v3017_v31, %v3015_v57  ;;  %v3342_v57 = vld [vmem:[%s3819_s6] ss:$0 sm:$0xff] }
 0x15f   :  { %v535_v34 = vpop.f32.mrf.mxu0 }
 0x160   :  { %v642_v41 = vpack.c.bf16 %v535_v34, %v535_v34 }
 0x162   :  { %2124 = vmatmul.msk.bf16.gmra.mxu0 %vm420_vm2, %v393_v4  ;;  %v3025_v5 = vunpack.c.l.b16 %v642_v41 }
 0x167   :  { %v537_v47 = vpop.f32.mrf.mxu0 }
 0x168   :  { %v643_v2 = vpack.c.bf16 %v537_v47, %v537_v47 }
 0x16a   :  { %v3027_v7 = vunpack.c.l.b16 %v643_v2 }
 0x16c   :  { %v761_v12 = vpack.c.b16 %v3027_v7, %v3025_v5 }
 0x16f   :  { %v540_v42 = vpop.f32.mrf.mxu0 }
 0x170   :  { %v644_v48 = vpack.c.bf16 %v540_v42, %v540_v42 }
 0x172   :  { %2125 = vmatmul.msk.bf16.gmra.mxu0 %vm420_vm2, %v394_v13  ;;  %v3035_v4 = vunpack.c.l.b16 %v644_v48 }
 0x177   :  { %v542_v0 = vpop.f32.mrf.mxu0 }
 0x178   :  { %v645_v1 = vpack.c.bf16 %v542_v0, %v542_v0 }
 0x17a   :  { %v3037_v37 = vunpack.c.l.b16 %v645_v1 }
 0x17c   :  { %v762_v38 = vpack.c.b16 %v3037_v37, %v3035_v4 }
 0x17f   :  { %v545_v59 = vpop.f32.mrf.mxu0 }
 0x180   :  { %v646_v60 = vpack.c.bf16 %v545_v59, %v545_v59  ;;  %v3119_v59 = vld [vmem:[%s3816_s1 + $0x48] sm:$0xff] }
 0x182   :  { %2126 = vmatmul.msk.bf16.gmra.mxu0 %vm420_vm2, %v395_v30  ;;  %v3045_v13 = vunpack.c.l.b16 %v646_v60 }
 0x187   :  { %v547_v10 = vpop.f32.mrf.mxu0 }
 0x188   :  { %v647_v11 = vpack.c.bf16 %v547_v10, %v547_v10 }
 0x18a   :  { %v3047_v56 = vunpack.c.l.b16 %v647_v11  ;;  %v3124_v11 = vpop.f32.mrf.mxu3 }
 0x18f   :  { %v550_v63 = vpop.f32.mrf.mxu0 }
 0x190   :  { %v648_v62 = vpack.c.bf16 %v550_v63, %v550_v63 }
 0x192   :  { %2127 = vmatmul.msk.bf16.gmra.mxu0 %vm420_vm2, %v396_v25  ;;  %v3055_v30 = vunpack.c.l.b16 %v648_v62  ;;  %v3080_v25 = vld [vmem:[%s3816_s1 + $0x30] sm:$0xff] }
 0x193   :  { %2229 = vmatmul.msk.bf16.vlgmr.msra.gmra.mxu2 %vm420_vm2, %v3080_v25 }
 0x197   :  { %v552_v17 = vpop.f32.mrf.mxu0 }
 0x198   :  { %v649_v24 = vpack.c.bf16 %v552_v17, %v552_v17 }
 0x19a   :  { %v3057_v43 = vunpack.c.l.b16 %v649_v24 }
 0x19f   :  { %v555_v21 = vpop.f32.mrf.mxu0 }
 0x1a0   :  { %v650_v26 = vpack.c.bf16 %v555_v21, %v555_v21 }
 0x1a2   :  { %2128 = vmatmul.msk.bf16.gmra.mxu0 %vm420_vm2, %v397_v40  ;;  %v3084_v45 = vunpack.c.l.b16 %v650_v26  ;;  %v3097_v40 = vld [vmem:[%s3816_s1 + $0x38] sm:$0xff]  ;;  %v3129_v26 = vld [vmem:[%s3816_s1 + $0x50] sm:$0xff] }
 0x1a3   :  { %2230 = vmatmul.msk.bf16.gmra.mxu2 %vm420_vm2, %v3097_v40 }
 0x1a7   :  { %v557_v29 = vpop.f32.mrf.mxu0 }
 0x1a8   :  { %v651_v44 = vpack.c.bf16 %v557_v29, %v557_v29  ;;  %v3131_v29 = vpop.f32.mrf.mxu3 }
 0x1aa   :  { %v3086_v15 = vunpack.c.l.b16 %v651_v44 }
 0x1af   :  { %v560_v39 = vpop.f32.mrf.mxu0 }
 0x1b0   :  { %v652_v28 = vpack.c.bf16 %v560_v39, %v560_v39 }
 0x1b2   :  { %2129 = vmatmul.msk.bf16.gmra.mxu0 %vm420_vm2, %v398_v53  ;;  %v3101_v34 = vunpack.c.l.b16 %v652_v28  ;;  %v3112_v53 = vld [vmem:[%s3816_s1 + $0x40] sm:$0xff]  ;;  %v3136_v28 = vpop.f32.mrf.mxu3 }
 0x1b3   :  { %2231 = vmatmul.msk.bf16.gmra.mxu2 %vm420_vm2, %v3112_v53 }
 0x1b7   :  { %v562_v54 = vpop.f32.mrf.mxu0 }
 0x1b8   :  { %v653_v55 = vpack.c.bf16 %v562_v54, %v562_v54 }
 0x1ba   :  { %v3103_v41 = vunpack.c.l.b16 %v653_v55 }
 0x1bf   :  { %v3107_v49 = vpop.f32.mrf.mxu0 }
 0x1c3   :  { %2232 = vmatmul.msk.bf16.gmra.mxu2 %vm420_vm2, %v3119_v59 }
 0x1c7   :  { %v567_v47 = vpop.f32.mrf.mxu0 }
 0x1c8   :  { %v655_v2 = vpack.c.bf16 %v567_v47, %v567_v47 }
 0x1ca   :  { %v793_v0 = vunpack.c.l.b16 %v655_v2  ;;  %v2310_v2 = vld [vmem:[%s3815_s3 + $0x38] sm:$0xff] }
 0x1cb   :  { %1096 = vmatpush.bf16.msra.mxu1 %v2310_v2 }
 0x1cf   :  { %v570_v42 = vpop.f32.mrf.mxu0 }
 0x1d0   :  { %v656_v48 = vpack.c.bf16 %v570_v42, %v570_v42  ;;  %v2320_v42 = vld [vmem:[%s3817_s4 + $0x38] sm:$0xff] }
 0x1d1   :  { %1326 = vmatpush.bf16.msrb.mxu3 %v2320_v42 }
 0x1d2   :  { %v794_v1 = vunpack.c.l.b16 %v656_v48 }
 0x1d3   :  { %2233 = vmatmul.msk.bf16.gmra.mxu2 %vm420_vm2, %v3129_v26 }
 0x1d4   :  { %v818_v60 = vpack.c.b16 %v794_v1, %v793_v0  ;;  %v3147_v1 = vld [vmem:[%s3816_s1 + $0x58] sm:$0xff] }
 0x1d6   :  { %831 = vrot.lane.b32.xlu2 %v818_v60, %s2538_s22 }
 0x1d7   :  { %v572_v10 = vpop.f32.mrf.mxu0 }
 0x1d8   :  { %v657_v63 = vpack.c.bf16 %v572_v10, %v572_v10  ;;  %v2309_v10 = vld [vmem:[%s3815_s3 + $0x30] sm:$0xff] }
 0x1d9   :  { %1097 = vmatpush.bf16.msra.mxu1 %v2309_v10 }
 0x1da   :  { %v795_v24 = vunpack.c.l.b16 %v657_v63  ;;  %v2319_v63 = vld [vmem:[%s3817_s4 + $0x30] sm:$0xff] }
 0x1db   :  { %1327 = vmatpush.bf16.msrb.mxu3 %v2319_v63 }
 0x1df   :  { %v575_v62 = vpop.f32.mrf.mxu0 }
 0x1e0   :  { %v658_v17 = vpack.c.bf16 %v575_v62, %v575_v62  ;;  %v3158_v62 = vpop.f32.mrf.mxu3 }
 0x1e2   :  { %v796_v21 = vunpack.c.l.b16 %v658_v17 }
 0x1e3   :  { %2234 = vmatmul.msk.bf16.gmra.mxu2 %vm420_vm2, %v3147_v1 }
 0x1e4   :  { %v819_v44 = vpack.c.b16 %v796_v21, %v795_v24  ;;  %v2308_v24 = vld [vmem:[%s3815_s3 + $0x28] sm:$0xff] }
 0x1e5   :  { %v2318_v21 = vld [vmem:[%s3817_s4 + $0x28] sm:$0xff]  ;;  %1098 = vmatpush.bf16.msra.mxu1 %v2308_v24 }
 0x1e6   :  { %833 = vrot.lane.b32.xlu0 %v819_v44, %s2538_s22  ;;  %1328 = vmatpush.bf16.msrb.mxu3 %v2318_v21  ;;  %v2307_v44 = vld [vmem:[%s3815_s3 + $0x20] sm:$0xff]  ;;  %v2305_v21 = vld [vmem:[%s3815_s3 + $0x10] sm:$0xff] }
 0x1e7   :  { %v577_v39 = vpop.f32.mrf.mxu0 }
 0x1e8   :  { %v659_v54 = vpack.c.bf16 %v577_v39, %v577_v39  ;;  %v2317_v39 = vld [vmem:[%s3817_s4 + $0x20] sm:$0xff] }
 0x1e9   :  { %1099 = vmatpush.bf16.msra.mxu1 %v2307_v44  ;;  %v2315_v44 = vld [vmem:[%s3817_s4 + $0x10] sm:$0xff] }
 0x1ea   :  { %v797_v48 = vunpack.c.l.b16 %v659_v54  ;;  %1329 = vmatpush.bf16.msrb.mxu3 %v2317_v39 }
 0x1ef   :  { %v580_v55 = vpop.f32.mrf.mxu0 }
 0x1f0   :  { %v660_v47 = vpack.c.bf16 %v580_v55, %v580_v55 }
 0x1f2   :  { %v798_v0 = vunpack.c.l.b16 %v660_v47  ;;  %v704_v47 = vld [vmem:[%s3816_s1 + $0x60] sm:$0xf] }
 0x1f3   :  { %v906_v42 = vunpack.c.l.b16 %v704_v47  ;;  %v2322_v47 = vld [vmem:[%s3817_s4 + $0x48] sm:$0xff] }
 0x1f4   :  { %v820_v60 = vpack.c.b16 %v798_v0, %v797_v48  ;;  %v3175_v48 = vpop.f32.mrf.mxu3  ;;  %v2306_v0 = vld [vmem:[%s3815_s3 + $0x18] sm:$0xff]  ;;  %1405 = vmatpush.bf16.msrb.mxu2 %v2322_v47 }
 0x1f5   :  { %1100 = vmatpush.bf16.msra.mxu1 %v2306_v0  ;;  %v2313_v0 = vld [vmem:[%s3817_s4] sm:$0xff] }
 0x1f6   :  { %835 = vrot.lane.b32.xlu1 %v820_v60, %s2538_s22  ;;  %v2316_v60 = vld [vmem:[%s3817_s4 + $0x18] sm:$0xff] }
 0x1f7   :  { %v582_v17 = vpop.f32.mrf.mxu0  ;;  %1330 = vmatpush.bf16.msrb.mxu3 %v2316_v60 }
 0x1f8   :  { %v661_v54 = vpack.c.bf16 %v582_v17, %v582_v17  ;;  %v3183_v17 = vpack.c.b16 %v906_v42, %v906_v42  ;;  %v2303_v42 = vld [vmem:[%s3815_s3] sm:$0xff] }
 0x1f9   :  { %1101 = vmatpush.bf16.msra.mxu1 %v2305_v21 }
 0x1fa   :  { %v799_v10 = vunpack.c.l.b16 %v661_v54  ;;  %2235 = vmatmul.msk.bf16.gmra.mxu2 %vm420_vm2, %v3183_v17  ;;  %v2304_v54 = vld [vmem:[%s3815_s3 + $0x8] sm:$0xff] }
 0x1fb   :  { %1331 = vmatpush.bf16.msrb.mxu3 %v2315_v44 }
 0x1fd   :  { %1102 = vmatpush.bf16.msra.mxu1 %v2304_v54  ;;  %v3218_v54 = vld [vmem:[%s3816_s1] sm:$0xff] }
 0x1ff   :  { %v585_v55 = vpop.f32.mrf.mxu0 }
 0x200   :  { %v662_v2 = vpack.c.bf16 %v585_v55, %v585_v55  ;;  %v2314_v55 = vld [vmem:[%s3817_s4 + $0x8] sm:$0xff] }
 0x201   :  { %1332 = vmatpush.bf16.msrb.mxu3 %v2314_v55  ;;  %1103 = vmatpush.bf16.msra.mxu1 %v2303_v42 }
 0x202   :  { %v800_v63 = vunpack.c.l.b16 %v662_v2  ;;  %v3203_v2 = vpop.f32.mrf.mxu3 }
 0x204   :  { %v821_v24 = vpack.c.b16 %v800_v63, %v799_v10  ;;  %v2321_v63 = vld [vmem:[%s3817_s4 + $0x40] sm:$0xff] }
 0x205   :  { %1333 = vmatpush.bf16.msrb.mxu3 %v2313_v0  ;;  %1175 = vmatpush.bf16.msrb.mxu1 %v3062_v46 }
 0x206   :  { %837 = vrot.lane.b32.xlu2 %v821_v24, %s2538_s22  ;;  %1406 = vmatpush.bf16.msrb.mxu2 %v2321_v63 }
 0x207   :  { %v587_v39 = vpop.f32.mrf.mxu0 }
 0x208   :  { %v663_v60 = vpack.c.bf16 %v587_v39, %v587_v39 }
 0x209   :  { %1176 = vmatpush.bf16.msrb.mxu1 %v3070_v23 }
 0x20a   :  { %v801_v21 = vunpack.c.l.b16 %v663_v60  ;;  %2276 = vmatmul.msk.bf16.vlgmr.msrb.gmra.mxu2 %vm420_vm2, %v3218_v54  ;;  %v620_v39 = vpop.f32.mrf.mxu3 }
 0x20f   :  { %v590_v10 = vpop.f32.mrf.mxu0 }
 0x210   :  { %v664_v24 = vpack.c.bf16 %v590_v10, %v590_v10 }
 0x212   :  { %v802_v44 = vunpack.c.l.b16 %v664_v24  ;;  %v622_v46 = vpop.f32.mrf.mxu3  ;;  %v672_v24 = vpack.c.bf16 %v3136_v28, %v3136_v28 }
 0x214   :  { %v822_v55 = vpack.c.b16 %v802_v44, %v801_v21  ;;  %v671_v21 = vpack.c.bf16 %v3131_v29, %v3131_v29 }
 0x216   :  { %839 = vrot.lane.b32.xlu0 %v822_v55, %s2538_s22  ;;  %v3229_v44 = vpop.f32.mrf.mxu2  ;;  %v810_v55 = vunpack.c.l.b16 %v672_v24 }
 0x217   :  { %v592_v47 = vpop.f32.mrf.mxu0 }
 0x218   :  { %v665_v42 = vpack.c.bf16 %v592_v47, %v592_v47  ;;  %v809_v47 = vunpack.c.l.b16 %v671_v21 }
 0x21a   :  { %v803_v10 = vunpack.c.l.b16 %v665_v42  ;;  %v625_v35 = vpop.f32.mrf.mxu3  ;;  %v826_v51 = vpack.c.b16 %v810_v55, %v809_v47 }
 0x21b   :  { %v678_v61 = vpack.c.bf16 %v625_v35, %v625_v35 }
 0x21f   :  { %v595_v0 = vpop.f32.mrf.mxu0 }
 0x220   :  { %v666_v60 = vpack.c.bf16 %v595_v0, %v595_v0  ;;  %v677_v0 = vpack.c.bf16 %v622_v46, %v622_v46 }
 0x222   :  { %v804_v63 = vunpack.c.l.b16 %v666_v60  ;;  %v3232_v60 = vpop.f32.mrf.mxu2  ;;  %v815_v24 = vunpack.c.l.b16 %v677_v0  ;;  %v627_v0 = vpop.f32.mrf.mxu3 }
 0x224   :  { %v823_v14 = vpack.c.b16 %v804_v63, %v803_v10  ;;  %v816_v10 = vunpack.c.l.b16 %v678_v61  ;;  %v670_v61 = vpack.c.bf16 %v3124_v11, %v3124_v11  ;;  %v3251_v11 = vld [vmem:[%s3816_s1 + $0x8] sm:$0xff] }
 0x225   :  { %2277 = vmatmul.msk.bf16.gmra.mxu2 %vm420_vm2, %v3251_v11 }
 0x226   :  { %841 = vrot.lane.b32.xlu1 %v823_v14, %s2538_s22  ;;  %v829_v35 = vpack.c.b16 %v816_v10, %v815_v24 }
 0x227   :  { %v597_v23 = vpop.f32.mrf.mxu0 }
 0x228   :  { %v667_v42 = vpack.c.bf16 %v597_v23, %v597_v23  ;;  %v673_v23 = vpack.c.bf16 %v3158_v62, %v3158_v62  ;;  %v676_v62 = vpack.c.bf16 %v620_v39, %v620_v39 }
 0x22a   :  { %v805_v21 = vunpack.c.l.b16 %v667_v42  ;;  %v3246_v22 = vpop.f32.mrf.mxu2  ;;  %v808_v42 = vunpack.c.l.b16 %v670_v61 }
 0x22e   :  { %847 = vrot.lane.b32.xlu1 %v826_v51, %s2538_s22  ;;  %v674_v51 = vpack.c.bf16 %v3175_v48, %v3175_v48  ;;  %v811_v48 = vunpack.c.l.b16 %v673_v23 }
 0x22f   :  { %v600_v28 = vpop.f32.mrf.mxu0 }
 0x230   :  { %v668_v29 = vpack.c.bf16 %v600_v28, %v600_v28  ;;  %v832_v63 = vpop.permute.xlu2 %831 }
 0x231   :  { %v923_v14 = vsel %vm920_vm6, %v755_v27, %v832_v63  ;;  %v812_v27 = vunpack.c.l.b16 %v674_v51 }
 0x232   :  { %v806_v55 = vunpack.c.l.b16 %v668_v29  ;;  %1104 = vmatmul.bf16.vlgmr.msra.gmra.mxu1 %v923_v14  ;;  %1334 = vmatmul.bf16.vlgmr.msrb.gmra.mxu3 %v923_v14  ;;  %v679_v29 = vpack.c.bf16 %v627_v0, %v627_v0  ;;  %v675_v14 = vpack.c.bf16 %v3203_v2, %v3203_v2  ;;  %v3259_v24 = vpop.f32.mrf.mxu2  ;;  %v3268_v2 = vld [vmem:[%s3816_s1 + $0x10] sm:$0xff] }
 0x233   :  { %v827_v10 = vpack.c.b16 %v812_v27, %v811_v48 }
 0x234   :  { %v824_v46 = vpack.c.b16 %v806_v55, %v805_v21  ;;  %v814_v21 = vunpack.c.l.b16 %v676_v62  ;;  %v817_v55 = vunpack.c.l.b16 %v679_v29  ;;  %v813_v51 = vunpack.c.l.b16 %v675_v14 }
 0x235   :  { %2278 = vmatmul.msk.bf16.gmra.mxu2 %vm420_vm2, %v3268_v2 }
 0x236   :  { %843 = vrot.lane.b32.xlu2 %v824_v46, %s2538_s22  ;;  %853 = vrot.lane.b32.xlu1 %v829_v35, %s2538_s22  ;;  %v828_v35 = vpack.c.b16 %v814_v21, %v813_v51  ;;  %v830_v46 = vpack.c.b16 %v817_v55, %v817_v55  ;;  %v3823_v55 = vpack.c.b16 %v3047_v56, %v3045_v13 }
 0x237   :  { %v602_v16 = vpop.f32.mrf.mxu0 }
 0x238   :  { %v669_v47 = vpack.c.bf16 %v602_v16, %v602_v16 }
 0x23a   :  { %v807_v28 = vunpack.c.l.b16 %v669_v47  ;;  %v3263_v39 = vpop.f32.mrf.mxu2  ;;  %v3283_v47 = vld [vmem:[%s3816_s1 + $0x18] sm:$0xff] }
 0x23c   :  { %v825_v63 = vpack.c.b16 %v808_v42, %v807_v28 }
 0x23e   :  { %845 = vrot.lane.b32.xlu0 %v825_v63, %s2538_s22  ;;  %849 = vrot.lane.b32.xlu2 %v827_v10, %s2538_s22 }
 0x242   :  { %v3272_v61 = vpop.f32.mrf.mxu2 }
 0x245   :  { %2279 = vmatmul.msk.bf16.gmra.mxu2 %vm420_vm2, %v3283_v47 }
 0x246   :  { %851 = vrot.lane.b32.xlu0 %v828_v35, %s2538_s22  ;;  %855 = vrot.lane.b32.xlu2 %v830_v46, %s2538_s22 }
 0x24a   :  { %v3274_v23 = vpop.f32.mrf.mxu2 }
 0x252   :  { %v3287_v0 = vpop.f32.mrf.mxu2 }
 0x255   :  { %2280 = vmatmul.msk.bf16.gmra.mxu2 %vm420_vm2, %v3298_v58 }
 0x258   :  { %v834_v16 = vpop.permute.xlu0 %833 }
 0x259   :  { %v927_v27 = vsel %vm920_vm6, %v756_v36, %v834_v16  ;;  %v3824_v16 = vpack.c.b16 %v3057_v43, %v3055_v30 }
 0x25a   :  { %1109 = vmatmul.bf16.gmra.mxu1 %v927_v27  ;;  %1339 = vmatmul.bf16.gmra.mxu3 %v927_v27  ;;  %v3289_v42 = vpop.f32.mrf.mxu2 }
 0x260   :  { %v838_v28 = vpop.permute.xlu2 %837 }
 0x261   :  { %v935_v18 = vsel %vm920_vm6, %v758_v8, %v838_v28 }
 0x262   :  { %v3302_v36 = vpop.f32.mrf.mxu2 }
 0x265   :  { %2281 = vmatmul.msk.bf16.gmra.mxu2 %vm420_vm2, %v3313_v19 }
 0x268   :  { %v836_v48 = vpop.permute.xlu1 %835 }
 0x269   :  { %v931_v52 = vsel %vm920_vm6, %v757_v20, %v836_v48 }
 0x26a   :  { %1114 = vmatmul.bf16.gmra.mxu1 %v931_v52  ;;  %1344 = vmatmul.bf16.gmra.mxu3 %v931_v52  ;;  %v3304_v10 = vpop.f32.mrf.mxu2 }
 0x272   :  { %v3317_v20 = vpop.f32.mrf.mxu2 }
 0x275   :  { %2282 = vmatmul.msk.bf16.gmra.mxu2 %vm420_vm2, %v3080_v25 }
 0x27a   :  { %1119 = vmatmul.bf16.gmra.mxu1 %v935_v18  ;;  %1349 = vmatmul.bf16.gmra.mxu3 %v935_v18 }
 0x27d   :  { %v3319_v62 = vpop.f32.mrf.mxu2 }
 0x285   :  { %v1240_v6 = vpop.f32.mrf.mxu2  ;;  %2283 = vmatmul.msk.bf16.gmra.mxu2 %vm420_vm2, %v3097_v40 }
 0x288   :  { %v840_v29 = vpop.permute.xlu0 %839 }
 0x289   :  { %v939_v3 = vsel %vm920_vm6, %v759_v9, %v840_v29 }
 0x28a   :  { %1124 = vmatmul.bf16.gmra.mxu1 %v939_v3  ;;  %1354 = vmatmul.bf16.gmra.mxu3 %v939_v3 }
 0x28d   :  { %v1408_v9 = vpop.f32.mrf.mxu2 }
 0x290   :  { %v844_v50 = vpop.permute.xlu2 %843 }
 0x291   :  { %v947_v32 = vsel %vm920_vm6, %v761_v12, %v844_v50 }
 0x295   :  { %2284 = vmatmul.msk.bf16.gmra.mxu2 %vm420_vm2, %v3112_v53  ;;  %v3345_v40 = vpop.f32.mrf.mxu2 }
 0x298   :  { %v842_v8 = vpop.permute.xlu1 %841 }
 0x299   :  { %v943_v63 = vsel %vm920_vm6, %v760_v33, %v842_v8 }
 0x29a   :  { %1129 = vmatmul.bf16.gmra.mxu1 %v943_v63  ;;  %1359 = vmatmul.bf16.gmra.mxu3 %v943_v63 }
 0x2a0   :  { %v848_v14 = vpop.permute.xlu1 %847 }
 0x2a1   :  { %v955_v51 = vsel %vm920_vm6, %v3823_v55, %v848_v14  ;;  %v654_v55 = vpack.c.bf16 %v3107_v49, %v3107_v49 }
 0x2a5   :  { %2285 = vmatmul.msk.bf16.gmra.mxu2 %vm420_vm2, %v3119_v59  ;;  %v850_v59 = vpop.permute.xlu2 %849 }
 0x2a6   :  { %v959_v13 = vsel %vm920_vm6, %v3824_v16, %v850_v59 }
 0x2a8   :  { %v1413_v12 = vpop.f32.mrf.mxu2 }
 0x2aa   :  { %1134 = vmatmul.bf16.gmra.mxu1 %v947_v32  ;;  %1364 = vmatmul.bf16.gmra.mxu3 %v947_v32 }
 0x2af   :  { %v3355_v53 = vpop.f32.mrf.mxu1 }
 0x2b0   :  { %v846_v33 = vpop.permute.xlu0 %845  ;;  %v1415_v21 = vpop.f32.mrf.mxu2 }
 0x2b1   :  { %v951_v7 = vsel %vm920_vm6, %v762_v38, %v846_v33  ;;  %v854_v33 = vpop.permute.xlu1 %853 }
 0x2b5   :  { %v1335_v31 = vpop.f32.mrf.mxu3  ;;  %2286 = vmatmul.msk.bf16.gmra.mxu2 %vm420_vm2, %v3129_v26 }
 0x2b6   :  { %v1336_v25 = vadd.f32 %v3342_v57, %v1335_v31 }
 0x2b7   :  { %v3363_v4 = vpop.f32.mrf.mxu1 }
 0x2b8   :  { %v3347_v5 = vadd.f32 %v1408_v9, %v1336_v25  ;;  %v1418_v37 = vpop.f32.mrf.mxu2  ;;  %v852_v18 = vpop.permute.xlu0 %851 }
 0x2ba   :  { %1139 = vmatmul.bf16.gmra.mxu1 %v951_v7  ;;  %1369 = vmatmul.bf16.gmra.mxu3 %v951_v7 }
 0x2bd   :  { %v3365_v38 = vpop.f32.mrf.mxu3 }
 0x2c0   :  { %v1420_v46 = vpop.f32.mrf.mxu2 }
 0x2c5   :  { %2287 = vmatmul.msk.bf16.gmra.mxu2 %vm420_vm2, %v3147_v1  ;;  %v3825_v1 = vpack.c.b16 %v3086_v15, %v3084_v45 }
 0x2c7   :  { %v963_v6 = vsel %vm920_vm6, %v3825_v1, %v852_v18 }
 0x2c8   :  { %v1423_v48 = vpop.f32.mrf.mxu2 }
 0x2ca   :  { %1144 = vmatmul.bf16.gmra.mxu1 %v955_v51  ;;  %1374 = vmatmul.bf16.gmra.mxu3 %v955_v51 }
 0x2d0   :  { %v1425_v43 = vpop.f32.mrf.mxu2 }
 0x2d5   :  { %2288 = vmatmul.msk.bf16.gmra.mxu2 %vm420_vm2, %v3183_v17  ;;  %v3826_v17 = vpack.c.b16 %v3103_v41, %v3101_v34 }
 0x2d7   :  { %v3367_v35 = vpop.f32.mrf.mxu1 }
 0x2d8   :  { %v1428_v32 = vpop.f32.mrf.mxu2 }
 0x2da   :  { %1149 = vmatmul.bf16.gmra.mxu1 %v959_v13  ;;  %1379 = vmatmul.bf16.gmra.mxu3 %v959_v13  ;;  %v856_v13 = vpop.permute.xlu2 %855 }
 0x2dd   :  { %v1340_v56 = vpop.f32.mrf.mxu3 }
 0x2de   :  { %v1341_v26 = vadd.f32 %v3342_v57, %v1340_v56 }
 0x2df   :  { %v3376_v27 = vpop.f32.mrf.mxu1 }
 0x2e0   :  { %v3378_v52 = vadd.f32 %v1413_v12, %v1341_v26  ;;  %v1430_v15 = vpop.f32.mrf.mxu2  ;;  %v967_v12 = vsel %vm920_vm6, %v3826_v17, %v854_v33 }
 0x2e5   :  { %v1342_v28 = vpop.f32.mrf.mxu3 }
 0x2e6   :  { %v1343_v29 = vadd.f32 %v3342_v57, %v1342_v28 }
 0x2e7   :  { %v3381_v30 = vpop.f32.mrf.mxu1 }
 0x2e8   :  { %v3383_v3 = vadd.f32 %v1415_v21, %v1343_v29 }
 0x2ea   :  { %1154 = vmatmul.bf16.gmra.mxu1 %v963_v6  ;;  %1384 = vmatmul.bf16.gmra.mxu3 %v963_v6 }
 0x2ed   :  { %v1345_v8 = vpop.f32.mrf.mxu3 }
 0x2ee   :  { %v1346_v63 = vadd.f32 %v3342_v57, %v1345_v8 }
 0x2ef   :  { %v3392_v50 = vpop.f32.mrf.mxu1 }
 0x2f0   :  { %v3394_v9 = vadd.f32 %v1418_v37, %v1346_v63  ;;  %v1433_v37 = vpop.f32.mrf.mxu2 }
 0x2f5   :  { %v1347_v31 = vpop.f32.mrf.mxu3 }
 0x2f6   :  { %v1348_v25 = vadd.f32 %v3342_v57, %v1347_v31 }
 0x2f7   :  { %v3397_v45 = vpop.f32.mrf.mxu1 }
 0x2f8   :  { %v3399_v7 = vadd.f32 %v1420_v46, %v1348_v25  ;;  %v754_v46 = vunpack.c.l.b16 %v654_v55  ;;  %v1435_v26 = vpop.f32.mrf.mxu2 }
 0x2fa   :  { %1159 = vmatmul.bf16.gmra.mxu1 %v967_v12  ;;  %1389 = vmatmul.bf16.gmra.mxu3 %v967_v12  ;;  %v767_v41 = vpack.c.b16 %v754_v46, %v754_v46 }
 0x2fc   :  { %v971_v18 = vsel %vm920_vm6, %v767_v41, %v856_v13 }
 0x2fd   :  { %v1350_v14 = vpop.f32.mrf.mxu3 }
 0x2fe   :  { %v1351_v21 = vadd.f32 %v3342_v57, %v1350_v14 }
 0x2ff   :  { %v3408_v51 = vpop.f32.mrf.mxu1 }
 0x300   :  { %v3410_v59 = vadd.f32 %v1423_v48, %v1351_v21  ;;  %v1438_v6 = vpop.f32.mrf.mxu2 }
 0x305   :  { %v1352_v16 = vpop.f32.mrf.mxu3 }
 0x306   :  { %v1353_v34 = vadd.f32 %v3342_v57, %v1352_v16 }
 0x307   :  { %v3413_v56 = vpop.f32.mrf.mxu1 }
 0x308   :  { %3827 = vst [vmem:[#allocation2_spill] sm:$0xff] %v3413_v56  ;;  %v3415_v28 = vadd.f32 %v1425_v43, %v1353_v34  ;;  %v1440_v43 = vpop.f32.mrf.mxu2 }
 0x30a   :  { %1164 = vmatmul.bf16.gmra.mxu1 %v971_v18  ;;  %1394 = vmatmul.bf16.gmra.mxu3 %v971_v18 }
 0x30d   :  { %v1355_v49 = vpop.f32.mrf.mxu3 }
 0x30e   :  { %v1356_v29 = vadd.f32 %v3342_v57, %v1355_v49 }
 0x30f   :  { %v3419_v48 = vpop.f32.mrf.mxu1 }
 0x310   :  { %3828 = vst [vmem:[#allocation3_spill] sm:$0xff] %v3419_v48  ;;  %v3421_v1 = vadd.f32 %v1428_v32, %v1356_v29  ;;  %v1443_v32 = vpop.f32.mrf.mxu2 }
 0x315   :  { %v1357_v8 = vpop.f32.mrf.mxu3 }
 0x316   :  { %v1358_v63 = vadd.f32 %v3342_v57, %v1357_v8 }
 0x317   :  { %v3424_v31 = vpop.f32.mrf.mxu1 }
 0x318   :  { %3829 = vst [vmem:[#allocation4_spill] sm:$0xff] %v3424_v31  ;;  %v3426_v33 = vadd.f32 %v1430_v15, %v1358_v63  ;;  %v3439_v15 = vld [vmem:[%s3818_s5] ss:$0 sm:$0xff]  ;;  %v1445_v13 = vpop.f32.mrf.mxu2 }
 0x31a   :  { %2223 = vmatmul.msk.bf16.vlgmr.msrb.gmra.mxu1 %vm420_vm2, %v3218_v54 }
 0x31d   :  { %v1360_v25 = vpop.f32.mrf.mxu3 }
 0x31e   :  { %v1361_v17 = vadd.f32 %v3342_v57, %v1360_v25 }
 0x31f   :  { %v3431_v12 = vpop.f32.mrf.mxu1 }
 0x320   :  { %3830 = vst [vmem:[#allocation5_spill] sm:$0xff] %v3431_v12  ;;  %v3433_v14 = vadd.f32 %v1433_v37, %v1361_v17  ;;  %v3452_v63 = vpop.f32.mrf.mxu2 }
 0x322   :  { %3831 = vst [vmem:[#allocation6_spill] sm:$0xff] %v3433_v14 }
 0x325   :  { %v1362_v21 = vpop.f32.mrf.mxu3 }
 0x326   :  { %v1363_v55 = vadd.f32 %v3342_v57, %v1362_v21 }
 0x327   :  { %v1135_v46 = vpop.f32.mrf.mxu1 }
 0x328   :  { %v3441_v16 = vadd.f32 %v1435_v26, %v1363_v55  ;;  %v1136_v54 = vadd.f32 %v3439_v15, %v1135_v46 }
 0x32a   :  { %3832 = vst [vmem:[#allocation7_spill] sm:$0xff] %v3441_v16  ;;  %2224 = vmatmul.msk.bf16.gmra.mxu1 %vm420_vm2, %v3251_v11  ;;  %v1209_v37 = vadd.f32 %v3229_v44, %v1136_v54 }
 0x32c   :  { %v1484_v29 = vsub.f32 0.0, %v1209_v37 }
 0x32d   :  { %v1365_v34 = vpop.f32.mrf.mxu3 }
 0x32e   :  { %v1366_v41 = vadd.f32 %v3342_v57, %v1365_v34  ;;  %v1521_v17 = vmul.f32 1.442695, %v1484_v29 }
 0x32f   :  { %v1137_v18 = vpop.f32.mrf.mxu1 }
 0x330   :  { %v3448_v49 = vadd.f32 %v1438_v6, %v1366_v41  ;;  %v1138_v8 = vadd.f32 %v3439_v15, %v1137_v18  ;;  %2335 = vpow2.f32 %v1521_v17  ;;  %v3462_v41 = vpop.f32.mrf.mxu2 }
 0x332   :  { %v1609_v26 = vand.u32 2147483647, %v3448_v49  ;;  %v1211_v11 = vadd.f32 %v3232_v60, %v1138_v8 }
 0x334   :  { %v1634_v25 = vsub.f32 0.0, %v1609_v26  ;;  %v1485_v37 = vsub.f32 0.0, %v1211_v11 }
 0x335   :  { %v1367_v21 = vpop.f32.mrf.mxu3 }
 0x336   :  { %v1671_v55 = vmul.f32 1.442695, %v1634_v25  ;;  %v1368_v44 = vadd.f32 %v3342_v57, %v1367_v21  ;;  %v1523_v29 = vmul.f32 1.442695, %v1485_v37 }
 0x337   :  { %v1140_v46 = vpop.f32.mrf.mxu1 }
 0x338   :  { %v1141_v54 = vadd.f32 %v3439_v15, %v1140_v46  ;;  %v3457_v6 = vadd.f32 %v1440_v43, %v1368_v44  ;;  %2337 = vpow2.f32 %v1671_v55  ;;  %v2336_v43 = vpop.eup %2335 }
 0x339   :  { %2339 = vpow2.f32 %v1523_v29  ;;  %v1559_v37 = vadd.f32 1.0, %v2336_v43 }
 0x33a   :  { %v1610_v34 = vand.u32 2147483647, %v3457_v6  ;;  %2225 = vmatmul.msk.bf16.gmra.mxu1 %vm420_vm2, %v3268_v2  ;;  %v1214_v60 = vadd.f32 %v3246_v22, %v1141_v54  ;;  %v3470_v54 = vpop.f32.mrf.mxu2 }
 0x33c   :  { %v1635_v18 = vsub.f32 0.0, %v1610_v34  ;;  %v1486_v11 = vsub.f32 0.0, %v1214_v60 }
 0x33d   :  { %v1370_v8 = vpop.f32.mrf.mxu3 }
 0x33e   :  { %v1673_v26 = vmul.f32 1.442695, %v1635_v18  ;;  %v1371_v25 = vadd.f32 %v3342_v57, %v1370_v8  ;;  %v2338_v17 = vpop.eup %2337  ;;  %v1525_v34 = vmul.f32 1.442695, %v1486_v11 }
 0x33f   :  { %v1142_v21 = vpop.f32.mrf.mxu1  ;;  %v1805_v44 = vadd.f32 1.0, %v2338_v17  ;;  %v1808_v46 = vmul.f32 -0.5, %v2338_v17  ;;  %v1811_v31 = vand.u32 2147483647, %v2338_v17 }
 0x340   :  { %v3466_v55 = vadd.f32 %v1443_v32, %v1371_v25  ;;  %v1143_v2 = vadd.f32 %v3439_v15, %v1142_v21  ;;  %2341 = vpow2.f32 %v1673_v26  ;;  %v2340_v25 = vpop.eup %2339 }
 0x341   :  { %2343 = vlog2.f32 %v1805_v44  ;;  %v1809_v8 = vadd.f32 1.0, %v1808_v46  ;;  %vm1812_vm7 = vcmp.lt.f32.partialorder %v1811_v31, 0.0004427343 }
 0x342   :  { %v1611_v22 = vand.u32 2147483647, %v3466_v55  ;;  %v1216_v12 = vadd.f32 %v3259_v24, %v1143_v2  ;;  %2345 = vrcp.f32 %v1559_v37  ;;  %v3480_v37 = vpop.f32.mrf.mxu2 }
 0x343   :  { %2347 = vpow2.f32 %v1525_v34  ;;  %v1810_v11 = vmul.f32 %v2338_v17, %v1809_v8  ;;  %v1934_v34 = vmax.f32 %v3448_v49, 0.0  ;;  %v1935_v49 = vmax.f32 %v3457_v6, 0.0 }
 0x344   :  { %v1636_v18 = vsub.f32 0.0, %v1611_v22  ;;  %v1487_v46 = vsub.f32 0.0, %v1216_v12 }
 0x345   :  { %v1372_v60 = vpop.f32.mrf.mxu3 }
 0x346   :  { %v1675_v32 = vmul.f32 1.442695, %v1636_v18  ;;  %v1373_v29 = vadd.f32 %v3342_v57, %v1372_v60  ;;  %v2342_v26 = vpop.eup %2341 }
 0x347   :  { %v1145_v21 = vpop.f32.mrf.mxu1  ;;  %v2344_v43 = vpop.eup %2343  ;;  %v1814_v44 = vadd.f32 1.0, %v2342_v26  ;;  %v1817_v24 = vmul.f32 -0.5, %v2342_v26  ;;  %v1820_v31 = vand.u32 2147483647, %v2342_v26 }
 0x348   :  { %v1146_v48 = vadd.f32 %v3439_v15, %v1145_v21  ;;  %v3475_v16 = vadd.f32 %v1445_v13, %v1373_v29  ;;  %v1807_v22 = vmul.f32 0.6931472, %v2344_v43  ;;  %2349 = vpow2.f32 %v1675_v32  ;;  %v2346_v12 = vpop.eup %2345 }
 0x349   :  { %2351 = vlog2.f32 %v1814_v44  ;;  %v1560_v13 = vadd.f32 1.0, %v2340_v25  ;;  %v1527_v29 = vmul.f32 1.442695, %v1487_v46  ;;  %v2348_v21 = vpop.eup %2347  ;;  %v1818_v43 = vadd.f32 1.0, %v1817_v24 }
 0x34a   :  { %v1612_v2 = vand.u32 2147483647, %v3475_v16  ;;  %2226 = vmatmul.msk.bf16.gmra.mxu1 %vm420_vm2, %v3283_v47  ;;  %v1813_v18 = vsel %vm1812_vm7, %v1810_v11, %v1807_v22  ;;  %v1219_v17 = vadd.f32 %v3263_v39, %v1146_v48  ;;  %v1561_v24 = vadd.f32 1.0, %v2348_v21 }
 0x34b   :  { %v1959_v60 = vadd.f32 %v1934_v34, %v1813_v18  ;;  %2353 = vrcp.f32 %v1560_v13  ;;  %v1819_v18 = vmul.f32 %v2342_v26, %v1818_v43  ;;  %vm1821_vm9 = vcmp.lt.f32.partialorder %v1820_v31, 0.0004427343 }
 0x34c   :  { %v1637_v8 = vsub.f32 0.0, %v1612_v2  ;;  %v1488_v11 = vsub.f32 0.0, %v1219_v17  ;;  %2355 = vpow2.f32 %v1527_v29 }
 0x34d   :  { %v1375_v32 = vpop.f32.mrf.mxu3  ;;  %v1984_v14 = vmul.f32 %v2346_v12, %v1959_v60  ;;  %v3490_v12 = vpop.f32.mrf.mxu2 }
 0x34e   :  { %v1677_v56 = vmul.f32 1.442695, %v1637_v8  ;;  %v1376_v47 = vadd.f32 %v3342_v57, %v1375_v32  ;;  %v2350_v25 = vpop.eup %2349  ;;  %v1529_v13 = vmul.f32 1.442695, %v1488_v11 }
 0x34f   :  { %v1147_v44 = vpop.f32.mrf.mxu1  ;;  %v2352_v46 = vpop.eup %2351  ;;  %v2009_v22 = vpack.c.bf16 %v1984_v14, %v1984_v14  ;;  %v1823_v2 = vadd.f32 1.0, %v2350_v25  ;;  %v1826_v8 = vmul.f32 -0.5, %v2350_v25  ;;  %v1829_v60 = vand.u32 2147483647, %v2350_v25 }
 0x350   :  { %v1148_v39 = vadd.f32 %v3439_v15, %v1147_v44  ;;  %v3488_v48 = vadd.f32 %v3452_v63, %v1376_v47  ;;  %v1816_v34 = vmul.f32 0.6931472, %v2352_v46  ;;  %2357 = vpow2.f32 %v1677_v56 }
 0x351   :  { %2035 = vst.msk [vmem:[%s3820_s7 + $0x30] sm:$0xf] %vm2022_vm8, %v2009_v22  ;;  %2359 = vlog2.f32 %v1823_v2  ;;  %v2354_v56 = vpop.eup %2353  ;;  %v1827_v32 = vadd.f32 1.0, %v1826_v8  ;;  %vm3503_vm10 = vcmp.lt.f32.partialorder %v1829_v60, 0.0004427343 }
 0x352   :  { %v1221_v63 = vadd.f32 %v3272_v61, %v1148_v39  ;;  %v1613_v14 = vand.u32 2147483647, %v3488_v48  ;;  %v1822_v6 = vsel %vm1821_vm9, %v1819_v18, %v1816_v34  ;;  %v2356_v43 = vpop.eup %2355  ;;  %2361 = vrcp.f32 %v1561_v24 }
 0x353   :  { %v1960_v17 = vadd.f32 %v1935_v49, %v1822_v6  ;;  %v1936_v61 = vmax.f32 %v3466_v55, 0.0  ;;  %2363 = vpow2.f32 %v1529_v13  ;;  %v1828_v8 = vmul.f32 %v2350_v25, %v1827_v32 }
 0x354   :  { %v1638_v26 = vsub.f32 0.0, %v1613_v14  ;;  %v1489_v44 = vsub.f32 0.0, %v1221_v63  ;;  %v1562_v6 = vadd.f32 1.0, %v2356_v43 }
 0x355   :  { %v1377_v29 = vpop.f32.mrf.mxu3  ;;  %v1985_v47 = vmul.f32 %v2354_v56, %v1960_v17  ;;  %v3510_v55 = vpop.f32.mrf.mxu2 }
 0x356   :  { %v1378_v21 = vadd.f32 %v3342_v57, %v1377_v29  ;;  %v1679_v31 = vmul.f32 1.442695, %v1638_v26  ;;  %v2358_v22 = vpop.eup %2357 }
 0x357   :  { %v1150_v46 = vpop.f32.mrf.mxu1  ;;  %v2360_v49 = vpop.eup %2359  ;;  %v2010_v39 = vpack.c.bf16 %v1985_v47, %v1985_v47  ;;  %v1832_v34 = vadd.f32 1.0, %v2358_v22  ;;  %v1835_v63 = vmul.f32 -0.5, %v2358_v22  ;;  %v1838_v47 = vand.u32 2147483647, %v2358_v22 }
 0x358   :  { %v3501_v11 = vadd.f32 %v3462_v41, %v1378_v21  ;;  %v1151_v24 = vadd.f32 %v3439_v15, %v1150_v46  ;;  %v1825_v18 = vmul.f32 0.6931472, %v2360_v49  ;;  %2365 = vpow2.f32 %v1679_v31  ;;  %v2362_v13 = vpop.eup %2361 }
 0x359   :  { %2036 = vst.msk [vmem:[%s3820_s7 + $0x34] sm:$0xf] %vm2022_vm8, %v2010_v39  ;;  %2367 = vlog2.f32 %v1832_v34  ;;  %v1531_v41 = vmul.f32 1.442695, %v1489_v44  ;;  %v2364_v29 = vpop.eup %2363  ;;  %v1836_v56 = vadd.f32 1.0, %v1835_v63  ;;  %v1937_v39 = vmax.f32 %v3475_v16, 0.0 }
 0x35a   :  { %2227 = vmatmul.msk.bf16.gmra.mxu1 %vm420_vm2, %v3298_v58  ;;  %v1614_v14 = vand.u32 2147483647, %v3501_v11  ;;  %v1831_v25 = vsel %vm3503_vm10, %v1828_v8, %v1825_v18  ;;  %v1224_v60 = vadd.f32 %v3274_v23, %v1151_v24  ;;  %vm1839_vm11 = vcmp.lt.f32.partialorder %v1838_v47, 0.0004427343 }
 0x35b   :  { %v1961_v17 = vadd.f32 %v1936_v61, %v1831_v25  ;;  %2369 = vpow2.f32 %v1531_v41  ;;  %v1837_v18 = vmul.f32 %v2358_v22, %v1836_v56  ;;  %v1563_v41 = vadd.f32 1.0, %v2364_v29 }
 0x35c   :  { %v1639_v58 = vsub.f32 0.0, %v1614_v14  ;;  %2371 = vrcp.f32 %v1562_v6  ;;  %v1490_v34 = vsub.f32 0.0, %v1224_v60 }
 0x35d   :  { %v1380_v26 = vpop.f32.mrf.mxu3  ;;  %v1986_v21 = vmul.f32 %v2362_v13, %v1961_v17  ;;  %v3526_v63 = vpop.f32.mrf.mxu2 }
 0x35e   :  { %v1381_v32 = vadd.f32 %v3342_v57, %v1380_v26  ;;  %v1681_v44 = vmul.f32 1.442695, %v1639_v58  ;;  %v2366_v46 = vpop.eup %2365  ;;  %v1533_v22 = vmul.f32 1.442695, %v1490_v34 }
 0x35f   :  { %v1152_v31 = vpop.f32.mrf.mxu1  ;;  %v2368_v61 = vpop.eup %2367  ;;  %v2011_v23 = vpack.c.bf16 %v1986_v21, %v1986_v21  ;;  %v1841_v2 = vadd.f32 1.0, %v2366_v46  ;;  %v1844_v8 = vmul.f32 -0.5, %v2366_v46  ;;  %v1938_v21 = vmax.f32 %v3488_v48, 0.0 }
 0x360   :  { %v1153_v43 = vadd.f32 %v3439_v15, %v1152_v31  ;;  %v3523_v49 = vadd.f32 %v3470_v54, %v1381_v32  ;;  %v1834_v24 = vmul.f32 0.6931472, %v2368_v61  ;;  %2373 = vpow2.f32 %v1681_v44 }
 0x361   :  { %2037 = vst.msk [vmem:[%s3820_s7 + $0x38] sm:$0xf] %vm2022_vm8, %v2011_v23  ;;  %2375 = vlog2.f32 %v1841_v2  ;;  %v2370_v6 = vpop.eup %2369  ;;  %v1845_v58 = vadd.f32 1.0, %v1844_v8  ;;  %v1847_v32 = vand.u32 2147483647, %v2366_v46 }
 0x362   :  { %v1615_v54 = vand.u32 2147483647, %v3523_v49  ;;  %v1840_v14 = vsel %vm1839_vm11, %v1837_v18, %v1834_v24  ;;  %v1226_v16 = vadd.f32 %v3287_v0, %v1153_v43  ;;  %v2372_v60 = vpop.eup %2371  ;;  %2377 = vrcp.f32 %v1563_v41 }
 0x363   :  { %v1962_v25 = vadd.f32 %v1937_v39, %v1840_v14  ;;  %v1564_v29 = vadd.f32 1.0, %v2370_v6  ;;  %2379 = vpow2.f32 %v1533_v22  ;;  %v1846_v24 = vmul.f32 %v2366_v46, %v1845_v58 }
 0x364   :  { %v1640_v13 = vsub.f32 0.0, %v1615_v54  ;;  %v1491_v61 = vsub.f32 0.0, %v1226_v16  ;;  %vm1848_vm12 = vcmp.lt.f32.partialorder %v1847_v32, 0.0004427343 }
 0x365   :  { %v1382_v17 = vpop.f32.mrf.mxu3  ;;  %v1987_v56 = vmul.f32 %v2372_v60, %v1962_v25  ;;  %v3542_v48 = vpop.f32.mrf.mxu2 }
 0x366   :  { %v1383_v26 = vadd.f32 %v3342_v57, %v1382_v17  ;;  %v1683_v47 = vmul.f32 1.442695, %v1640_v13  ;;  %v2374_v31 = vpop.eup %2373  ;;  %v1535_v54 = vmul.f32 1.442695, %v1491_v61 }
 0x367   :  { %v1155_v44 = vpop.f32.mrf.mxu1  ;;  %v2376_v43 = vpop.eup %2375  ;;  %v2012_v23 = vpack.c.bf16 %v1987_v56, %v1987_v56  ;;  %v1850_v39 = vadd.f32 1.0, %v2374_v31  ;;  %v1853_v18 = vmul.f32 -0.5, %v2374_v31  ;;  %v1856_v17 = vand.u32 2147483647, %v2374_v31 }
 0x368   :  { %v3537_v0 = vadd.f32 %v3480_v37, %v1383_v26  ;;  %v1156_v2 = vadd.f32 %v3439_v15, %v1155_v44  ;;  %v1843_v34 = vmul.f32 0.6931472, %v2376_v43  ;;  %2381 = vpow2.f32 %v1683_v47  ;;  %v2378_v6 = vpop.eup %2377 }
 0x369   :  { %2038 = vst.msk [vmem:[%s3820_s7 + $0x3c] sm:$0xf] %vm2022_vm8, %v2012_v23  ;;  %2383 = vlog2.f32 %v1850_v39  ;;  %v2380_v22 = vpop.eup %2379  ;;  %v1597_v56 = vand.u32 2147483647, %v3347_v5  ;;  %v1939_v44 = vmax.f32 %v3501_v11, 0.0 }
 0x36a   :  { %2228 = vmatmul.msk.bf16.gmra.mxu1 %vm420_vm2, %v3313_v19  ;;  %v1616_v37 = vand.u32 2147483647, %v3537_v0  ;;  %v1849_v8 = vsel %vm1848_vm12, %v1846_v24, %v1843_v34  ;;  %v1229_v46 = vadd.f32 %v3289_v42, %v1156_v2  ;;  %v1854_v19 = vadd.f32 1.0, %v1853_v18 }
 0x36b   :  { %v1963_v41 = vadd.f32 %v1938_v21, %v1849_v8  ;;  %2385 = vrcp.f32 %v1564_v29  ;;  %vm1857_vm2 = vcmp.lt.f32.partialorder %v1856_v17, 0.0004427343  ;;  %v1565_v34 = vadd.f32 1.0, %v2380_v22 }
 0x36c   :  { %v1641_v14 = vsub.f32 0.0, %v1616_v37  ;;  %2387 = vpow2.f32 %v1535_v54  ;;  %v1492_v43 = vsub.f32 0.0, %v1229_v46  ;;  %v1855_v23 = vmul.f32 %v2374_v31, %v1854_v19 }
 0x36d   :  { %v1385_v16 = vpop.f32.mrf.mxu3  ;;  %v1988_v13 = vmul.f32 %v2378_v6, %v1963_v41  ;;  %v3557_v2 = vpop.f32.mrf.mxu2  ;;  %v1622_v46 = vsub.f32 0.0, %v1597_v56 }
 0x36e   :  { %v1386_v25 = vadd.f32 %v3342_v57, %v1385_v16  ;;  %v1685_v60 = vmul.f32 1.442695, %v1641_v14  ;;  %v2382_v26 = vpop.eup %2381  ;;  %v1537_v31 = vmul.f32 1.442695, %v1492_v43 }
 0x36f   :  { %v1157_v58 = vpop.f32.mrf.mxu1  ;;  %v2384_v21 = vpop.eup %2383  ;;  %v2013_v47 = vpack.c.bf16 %v1988_v13, %v1988_v13  ;;  %v1859_v61 = vadd.f32 1.0, %v2382_v26  ;;  %v1862_v39 = vmul.f32 -0.5, %v2382_v26  ;;  %v1865_v19 = vand.u32 2147483647, %v2382_v26 }
 0x370   :  { %v1158_v32 = vadd.f32 %v3439_v15, %v1157_v58  ;;  %v3554_v42 = vadd.f32 %v3490_v12, %v1386_v25  ;;  %v1852_v29 = vmul.f32 0.6931472, %v2384_v21  ;;  %2389 = vpow2.f32 %v1685_v60 }
 0x371   :  { %2039 = vst.msk [vmem:[%s3820_s7 + $0x40] sm:$0xf] %vm2022_vm8, %v2013_v47  ;;  %2391 = vlog2.f32 %v1859_v61  ;;  %v2386_v18 = vpop.eup %2385  ;;  %v1863_v14 = vadd.f32 1.0, %v1862_v39  ;;  %v1940_v25 = vmax.f32 %v3523_v49, 0.0  ;;  %vm1866_vm13 = vcmp.lt.f32.partialorder %v1865_v19, 0.0004427343 }
 0x372   :  { %v1617_v12 = vand.u32 2147483647, %v3554_v42  ;;  %v1858_v24 = vsel %vm1857_vm2, %v1855_v23, %v1852_v29  ;;  %v1231_v11 = vadd.f32 %v3302_v36, %v1158_v32  ;;  %v2388_v41 = vpop.eup %2387  ;;  %2393 = vrcp.f32 %v1565_v34 }
 0x373   :  { %v1964_v37 = vadd.f32 %v1939_v44, %v1858_v24  ;;  %v1566_v56 = vadd.f32 1.0, %v2388_v41  ;;  %2395 = vpow2.f32 %v1537_v31  ;;  %v1864_v61 = vmul.f32 %v2382_v26, %v1863_v14 }
 0x374   :  { %v1642_v8 = vsub.f32 0.0, %v1617_v12  ;;  %v1493_v60 = vsub.f32 0.0, %v1231_v11  ;;  %v1338_v23 = vadd.f32 %v3342_v57, %v3365_v38  ;;  %v1941_v19 = vmax.f32 %v3537_v0, 0.0 }
 0x375   :  { %v1387_v54 = vpop.f32.mrf.mxu3  ;;  %v1989_v6 = vmul.f32 %v2386_v18, %v1964_v37  ;;  %v1470_v49 = vpop.f32.mrf.mxu2  ;;  %v1647_v37 = vmul.f32 1.442695, %v1622_v46 }
 0x376   :  { %v1388_v16 = vadd.f32 %v3342_v57, %v1387_v54  ;;  %v1687_v13 = vmul.f32 1.442695, %v1642_v8  ;;  %v2390_v22 = vpop.eup %2389  ;;  %v1539_v12 = vmul.f32 1.442695, %v1493_v60  ;;  %v3581_v38 = vadd.f32 %v3345_v40, %v1338_v23 }
 0x377   :  { %v1160_v17 = vpop.f32.mrf.mxu1  ;;  %v2392_v32 = vpop.eup %2391  ;;  %v2014_v21 = vpack.c.bf16 %v1989_v6, %v1989_v6  ;;  %v1868_v47 = vadd.f32 1.0, %v2390_v22  ;;  %v1871_v43 = vmul.f32 -0.5, %v2390_v22  ;;  %v1874_v34 = vand.u32 2147483647, %v2390_v22 }
 0x378   :  { %v1161_v36 = vadd.f32 %v3439_v15, %v1160_v17  ;;  %v3569_v58 = vadd.f32 %v3510_v55, %v1388_v16  ;;  %v1861_v44 = vmul.f32 0.6931472, %v2392_v32  ;;  %2397 = vpow2.f32 %v1687_v13  ;;  %v2394_v18 = vpop.eup %2393 }
 0x379   :  { %2040 = vst.msk [vmem:[%s3820_s7 + $0x44] sm:$0xf] %vm2022_vm8, %v2014_v21  ;;  %2399 = vlog2.f32 %v1868_v47  ;;  %v1872_v31 = vadd.f32 1.0, %v1871_v43  ;;  %v2396_v54 = vpop.eup %2395  ;;  %vm3587_vm14 = vcmp.lt.f32.partialorder %v1874_v34, 0.0004427343 }
 0x37a   :  { %v1234_v55 = vadd.f32 %v3304_v10, %v1161_v36  ;;  %v1618_v29 = vand.u32 2147483647, %v3569_v58  ;;  %v1867_v39 = vsel %vm1866_vm13, %v1864_v61, %v1861_v44  ;;  %2401 = vrcp.f32 %v1566_v56 }
 0x37b   :  { %v1965_v26 = vadd.f32 %v1940_v25, %v1867_v39  ;;  %2403 = vpow2.f32 %v1539_v12  ;;  %v1873_v21 = vmul.f32 %v2390_v22, %v1872_v31  ;;  %v1598_v0 = vand.u32 2147483647, %v3581_v38 }
 0x37c   :  { %v1643_v24 = vsub.f32 0.0, %v1618_v29  ;;  %v1494_v10 = vsub.f32 0.0, %v1234_v55  ;;  %v1567_v47 = vadd.f32 1.0, %v2396_v54 }
 0x37d   :  { %v1390_v11 = vpop.f32.mrf.mxu3  ;;  %v1990_v41 = vmul.f32 %v2394_v18, %v1965_v26  ;;  %v1623_v18 = vsub.f32 0.0, %v1598_v0 }
 0x37e   :  { %v1391_v8 = vadd.f32 %v3342_v57, %v1390_v11  ;;  %v1689_v14 = vmul.f32 1.442695, %v1643_v24  ;;  %v2398_v6 = vpop.eup %2397  ;;  %v1541_v40 = vmul.f32 1.442695, %v1494_v10 }
 0x37f   :  { %v1162_v16 = vpop.f32.mrf.mxu1  ;;  %v2400_v46 = vpop.eup %2399  ;;  %v2015_v13 = vpack.c.bf16 %v1990_v41, %v1990_v41  ;;  %v1877_v60 = vadd.f32 1.0, %v2398_v6  ;;  %v1880_v56 = vmul.f32 -0.5, %v2398_v6  ;;  %v1883_v26 = vand.u32 2147483647, %v2398_v6 }
 0x380   :  { %v3585_v25 = vadd.f32 %v3526_v63, %v1391_v8  ;;  %v1163_v36 = vadd.f32 %v3439_v15, %v1162_v16  ;;  %v1870_v32 = vmul.f32 0.6931472, %v2400_v46  ;;  %2405 = vpow2.f32 %v1689_v14  ;;  %v2402_v61 = vpop.eup %2401 }
 0x381   :  { %2041 = vst.msk [vmem:[%s3820_s7 + $0x48] sm:$0xf] %vm2022_vm8, %v2015_v13  ;;  %2407 = vlog2.f32 %v1877_v60  ;;  %v2404_v29 = vpop.eup %2403  ;;  %v1881_v23 = vadd.f32 1.0, %v1880_v56  ;;  %vm1884_vm15 = vcmp.lt.f32.partialorder %v1883_v26, 0.0004427343 }
 0x382   :  { %v1619_v63 = vand.u32 2147483647, %v3585_v25  ;;  %v1876_v44 = vsel %vm3587_vm14, %v1873_v21, %v1870_v32  ;;  %2409 = vpow2.f32 %v1647_v37  ;;  %v1236_v43 = vadd.f32 %v3317_v20, %v1163_v36 }
 0x383   :  { %v1966_v22 = vadd.f32 %v1941_v19, %v1876_v44  ;;  %2411 = vpow2.f32 %v1541_v40  ;;  %v1882_v16 = vmul.f32 %v2398_v6, %v1881_v23  ;;  %v1942_v19 = vmax.f32 %v3554_v42, 0.0 }
 0x384   :  { %v1644_v49 = vsub.f32 0.0, %v1619_v63  ;;  %2413 = vrcp.f32 %v1567_v47  ;;  %v1495_v10 = vsub.f32 0.0, %v1236_v43  ;;  %v1568_v17 = vadd.f32 1.0, %v2404_v29 }
 0x385   :  { %v1392_v55 = vpop.f32.mrf.mxu3  ;;  %v1991_v12 = vmul.f32 %v2402_v61, %v1966_v22  ;;  %v1649_v0 = vmul.f32 1.442695, %v1623_v18  ;;  %v1599_v47 = vand.u32 2147483647, %v3378_v52  ;;  %v1943_v23 = vmax.f32 %v3569_v58, 0.0 }
 0x386   :  { %v1393_v39 = vadd.f32 %v3342_v57, %v1392_v55  ;;  %v1691_v34 = vmul.f32 1.442695, %v1644_v49  ;;  %v2406_v11 = vpop.eup %2405  ;;  %v1543_v42 = vmul.f32 1.442695, %v1495_v10  ;;  %v1106_v10 = vadd.f32 %v3439_v15, %v3355_v53 }
 0x387   :  { %v1165_v24 = vpop.f32.mrf.mxu1  ;;  %v2408_v20 = vpop.eup %2407  ;;  %v2016_v8 = vpack.c.bf16 %v1991_v12, %v1991_v12  ;;  %v1886_v54 = vadd.f32 1.0, %v2406_v11  ;;  %v1889_v41 = vmul.f32 -0.5, %v2406_v11 }
 0x388   :  { %v1166_v31 = vadd.f32 %v3439_v15, %v1165_v24  ;;  %v3604_v37 = vadd.f32 %v3542_v48, %v1393_v39  ;;  %v1879_v14 = vmul.f32 0.6931472, %v2408_v20  ;;  %2415 = vpow2.f32 %v1691_v34  ;;  %v3607_v46 = vpop.eup %2409 }
 0x389   :  { %2042 = vst.msk [vmem:[%s3820_s7 + $0x4c] sm:$0xf] %vm2022_vm8, %v2016_v8  ;;  %2417 = vlog2.f32 %v1886_v54  ;;  %v2412_v36 = vpop.eup %2411  ;;  %v1890_v32 = vadd.f32 1.0, %v1889_v41  ;;  %v1697_v63 = vadd.f32 1.0, %v3607_v46 }
 0x38a   :  { %v1239_v48 = vadd.f32 %v3319_v62, %v1166_v31  ;;  %v1620_v13 = vand.u32 2147483647, %v3604_v37  ;;  %v1885_v60 = vsel %vm1884_vm15, %v1882_v16, %v1879_v14  ;;  %v2414_v40 = vpop.eup %2413  ;;  %v1892_v62 = vand.u32 2147483647, %v2406_v11 }
 0x38b   :  { %v1967_v6 = vadd.f32 %v1942_v19, %v1885_v60  ;;  %2419 = vrcp.f32 %v1568_v17  ;;  %v1569_v29 = vadd.f32 1.0, %v2412_v36  ;;  %v1891_v34 = vmul.f32 %v2406_v11, %v1890_v32 }
 0x38c   :  { %v1645_v21 = vsub.f32 0.0, %v1620_v13  ;;  %v1496_v22 = vsub.f32 0.0, %v1239_v48  ;;  %2421 = vpow2.f32 %v1543_v42  ;;  %vm1893_vm0 = vcmp.lt.f32.partialorder %v1892_v62, 0.0004427343 }
 0x38d   :  { %v1395_v56 = vpop.f32.mrf.mxu3  ;;  %v1992_v61 = vmul.f32 %v2414_v40, %v1967_v6  ;;  %v1624_v11 = vsub.f32 0.0, %v1599_v47  ;;  %v1600_v48 = vand.u32 2147483647, %v3383_v3  ;;  %v1700_v42 = vmul.f32 -0.5, %v3607_v46 }
 0x38e   :  { %v1396_v44 = vadd.f32 %v3342_v57, %v1395_v56  ;;  %v1693_v43 = vmul.f32 1.442695, %v1645_v21  ;;  %v2416_v55 = vpop.eup %2415  ;;  %v1545_v58 = vmul.f32 1.442695, %v1496_v22  ;;  %v1944_v22 = vmax.f32 %v3585_v25, 0.0 }
 0x38f   :  { %v1167_v49 = vpop.f32.mrf.mxu1  ;;  %v2418_v12 = vpop.eup %2417  ;;  %v2017_v26 = vpack.c.bf16 %v1992_v61, %v1992_v61  ;;  %v1895_v24 = vadd.f32 1.0, %v2416_v55  ;;  %v1898_v57 = vmul.f32 -0.5, %v2416_v55  ;;  %v1901_v17 = vand.u32 2147483647, %v2416_v55 }
 0x390   :  { %v3620_v39 = vadd.f32 %v3557_v2, %v1396_v44  ;;  %v1888_v18 = vmul.f32 0.6931472, %v2418_v12  ;;  %2423 = vpow2.f32 %v1693_v43  ;;  %v1651_v21 = vmul.f32 1.442695, %v1624_v11 }
 0x391   :  { %2043 = vst.msk [vmem:[%s3820_s7 + $0x50] sm:$0xf] %vm2022_vm8, %v2017_v26  ;;  %2425 = vlog2.f32 %v1895_v24  ;;  %v2420_v41 = vpop.eup %2419  ;;  %v1899_v14 = vadd.f32 1.0, %v1898_v57  ;;  %v1625_v62 = vsub.f32 0.0, %v1600_v48  ;;  %vm1902_vm1 = vcmp.lt.f32.partialorder %v1901_v17, 0.0004427343 }
 0x392   :  { %v1621_v31 = vand.u32 2147483647, %v3620_v39  ;;  %2427 = vpow2.f32 %v1649_v0  ;;  %v1894_v2 = vsel %vm1893_vm0, %v1891_v34, %v1888_v18  ;;  %v2422_v19 = vpop.eup %2421  ;;  %v1703_v26 = vand.u32 2147483647, %v3607_v46 }
 0x393   :  { %2429 = vlog2.f32 %v1697_v63  ;;  %v1968_v8 = vadd.f32 %v1943_v23, %v1894_v2  ;;  %v1900_v0 = vmul.f32 %v2416_v55, %v1899_v14  ;;  %v1570_v49 = vadd.f32 1.0, %v2422_v19 }
 0x394   :  { %v1646_v20 = vsub.f32 0.0, %v1621_v31  ;;  %2431 = vrcp.f32 %v1569_v29  ;;  %v1108_v55 = vadd.f32 %v3439_v15, %v3363_v4  ;;  %v1701_v18 = vadd.f32 1.0, %v1700_v42 }
 0x395   :  { %v1397_v54 = vpop.f32.mrf.mxu3  ;;  %v1993_v13 = vmul.f32 %v2420_v41, %v1968_v8  ;;  %2433 = vpow2.f32 %v1545_v58  ;;  %v1653_v25 = vmul.f32 1.442695, %v1625_v62  ;;  %v1601_v8 = vand.u32 2147483647, %v3394_v9 }
 0x396   :  { %v1695_v16 = vmul.f32 1.442695, %v1646_v20  ;;  %v2424_v36 = vpop.eup %2423  ;;  %vm3651_vm4 = vcmp.lt.f32.partialorder %v1703_v26, 0.0004427343 }
 0x397   :  { %v1178_v60 = vpop.f32.mrf.mxu1  ;;  %v2426_v32 = vpop.eup %2425  ;;  %v2018_v56 = vpack.c.bf16 %v1993_v13, %v1993_v13  ;;  %v1904_v40 = vadd.f32 1.0, %v2424_v36  ;;  %v1907_v47 = vmul.f32 -0.5, %v2424_v36  ;;  %v1910_v2 = vand.u32 2147483647, %v2424_v36 }
 0x398   :  { %2435 = vpow2.f32 %v1695_v16  ;;  %v1179_v6 = vadd.f32 %v1178_v60, %v1106_v10  ;;  %v3631_v53 = vpop.eup %2427  ;;  %v1897_v63 = vmul.f32 0.6931472, %v2426_v32  ;;  %v1702_v60 = vmul.f32 %v3607_v46, %v1701_v18 }
 0x399   :  { %v2430_v61 = vpop.eup %2429  ;;  %2044 = vst.msk [vmem:[%s3820_s7 + $0x54] sm:$0xf] %vm2022_vm8, %v2018_v56  ;;  %2437 = vlog2.f32 %v1904_v40  ;;  %v1706_v57 = vadd.f32 1.0, %v3631_v53  ;;  %v1908_v31 = vadd.f32 1.0, %v1907_v47  ;;  %vm1911_vm3 = vcmp.lt.f32.partialorder %v1910_v2, 0.0004427343 }
 0x39a   :  { %v1472_v44 = vsub.f32 0.0, %v1179_v6  ;;  %v2432_v43 = vpop.eup %2431  ;;  %v1903_v29 = vsel %vm1902_vm1, %v1900_v0, %v1897_v63  ;;  %2439 = vpow2.f32 %v1651_v21  ;;  %v1699_v10 = vmul.f32 0.6931472, %v2430_v61 }
 0x39b   :  { %v2434_v12 = vpop.eup %2433  ;;  %v1969_v34 = vadd.f32 %v1944_v22, %v1903_v29  ;;  %v1909_v48 = vmul.f32 %v2424_v36, %v1908_v31  ;;  %v1945_v6 = vmax.f32 %v3604_v37, 0.0  ;;  %v1626_v42 = vsub.f32 0.0, %v1601_v8 }
 0x39c   :  { %v1497_v23 = vmul.f32 1.442695, %v1472_v44  ;;  %v1571_v16 = vadd.f32 1.0, %v2434_v12  ;;  %v1709_v44 = vmul.f32 -0.5, %v3631_v53  ;;  %v1111_v61 = vadd.f32 %v3439_v15, %v3367_v35 }
 0x39d   :  { %v1994_v58 = vmul.f32 %v2432_v43, %v1969_v34  ;;  %v1705_v62 = vsel %vm3651_vm4, %v1702_v60, %v1699_v10  ;;  %v1602_v18 = vand.u32 2147483647, %v3399_v7  ;;  %v1946_v15 = vmax.f32 %v3620_v39, 0.0 }
 0x39e   :  { %v2436_v24 = vpop.eup %2435  ;;  %2441 = vpow2.f32 %v1497_v23  ;;  %v1655_v23 = vmul.f32 1.442695, %v1626_v42  ;;  %v1710_v2 = vadd.f32 1.0, %v1709_v44 }
 0x39f   :  { %v1913_v20 = vadd.f32 1.0, %v2436_v24  ;;  %v1180_v11 = vpop.f32.mrf.mxu1  ;;  %2443 = vrcp.f32 %v1570_v49  ;;  %v1916_v54 = vmul.f32 -0.5, %v2436_v24  ;;  %v2438_v41 = vpop.eup %2437  ;;  %v2019_v14 = vpack.c.bf16 %v1994_v58, %v1994_v58 }
 0x3a0   :  { %v1181_v4 = vadd.f32 %v1180_v11, %v1108_v55  ;;  %v1906_v19 = vmul.f32 0.6931472, %v2438_v41  ;;  %v3643_v17 = vpop.eup %2439  ;;  %v1919_v63 = vand.u32 2147483647, %v2436_v24 }
 0x3a1   :  { %2445 = vlog2.f32 %v1913_v20  ;;  %2045 = vst.msk [vmem:[%s3820_s7 + $0x58] sm:$0xf] %vm2022_vm8, %v2019_v14  ;;  %v1917_v56 = vadd.f32 1.0, %v1916_v54  ;;  %v1715_v22 = vadd.f32 1.0, %v3643_v17  ;;  %v1712_v20 = vand.u32 2147483647, %v3631_v53 }
 0x3a2   :  { %2447 = vlog2.f32 %v1706_v57  ;;  %v1473_v13 = vsub.f32 0.0, %v1181_v4  ;;  %v1912_v21 = vsel %vm1911_vm3, %v1909_v48, %v1906_v19  ;;  %vm1920_vm5 = vcmp.lt.f32.partialorder %v1919_v63, 0.0004427343  ;;  %v3674_v14 = vld [vmem:[%s3818_s5] ss:$0 sm:$0xff] }
 0x3a3   :  { %2449 = vpow2.f32 %v1653_v25  ;;  %v1970_v36 = vadd.f32 %v1945_v6, %v1912_v21  ;;  %v1918_v55 = vmul.f32 %v2436_v24, %v1917_v56  ;;  %v1922_v57 = vmax.f32 %v3347_v5, 0.0 }
 0x3a4   :  { %v2442_v32 = vpop.eup %2441  ;;  %v1499_v40 = vmul.f32 1.442695, %v1473_v13  ;;  %2451 = vrcp.f32 %v1571_v16  ;;  %v1627_v5 = vsub.f32 0.0, %v1602_v18  ;;  %v1113_v16 = vadd.f32 %v3674_v14, %v3376_v27 }
 0x3a5   :  { %v1547_v0 = vadd.f32 1.0, %v2442_v32  ;;  %v2444_v47 = vpop.eup %2443  ;;  %v1947_v8 = vadd.f32 %v1922_v57, %v1705_v62  ;;  %v1711_v48 = vmul.f32 %v3631_v53, %v1710_v2  ;;  %v1718_v13 = vmul.f32 -0.5, %v3643_v17 }
 0x3a6   :  { %2453 = vpow2.f32 %v1499_v40  ;;  %v1995_v43 = vmul.f32 %v2444_v47, %v1970_v36  ;;  %vm1713_vm6 = vcmp.lt.f32.partialorder %v1712_v20, 0.0004427343  ;;  %v1657_v40 = vmul.f32 1.442695, %v1627_v5 }
 0x3a7   :  { %v2446_v37 = vpop.eup %2445  ;;  %2455 = vrcp.f32 %v1547_v0  ;;  %v1183_v49 = vpop.f32.mrf.mxu1  ;;  %v1603_v36 = vand.u32 2147483647, %v3410_v59  ;;  %v1923_v53 = vmax.f32 %v3581_v38, 0.0  ;;  %v1719_v47 = vadd.f32 1.0, %v1718_v13 }
 0x3a8   :  { %v2448_v29 = vpop.eup %2447  ;;  %v1915_v12 = vmul.f32 0.6931472, %v2446_v37  ;;  %v1184_v26 = vadd.f32 %v1183_v49, %v1111_v61  ;;  %v2020_v35 = vpack.c.bf16 %v1995_v43, %v1995_v43  ;;  %2457 = vlog2.f32 %v1715_v22 }
 0x3a9   :  { %v3661_v34 = vpop.eup %2449  ;;  %v1708_v54 = vmul.f32 0.6931472, %v2448_v29  ;;  %2459 = vpow2.f32 %v1655_v23  ;;  %v1721_v61 = vand.u32 2147483647, %v3643_v17  ;;  %v1628_v43 = vsub.f32 0.0, %v1603_v36 }
 0x3aa   :  { %v1921_v31 = vsel %vm1920_vm5, %v1918_v55, %v1915_v12  ;;  %v1474_v25 = vsub.f32 0.0, %v1184_v26  ;;  %v2452_v58 = vpop.eup %2451  ;;  %2046 = vst.msk [vmem:[%s3820_s7 + $0x5c] sm:$0xf] %vm2022_vm8, %v2020_v35  ;;  %v1724_v32 = vadd.f32 1.0, %v3661_v34  ;;  %v1116_v49 = vadd.f32 %v3674_v14, %v3381_v30 }
 0x3ab   :  { %v1971_v24 = vadd.f32 %v1946_v15, %v1921_v31  ;;  %v1714_v56 = vsel %vm1713_vm6, %v1711_v48, %v1708_v54  ;;  %v1720_v23 = vmul.f32 %v3643_v17, %v1719_v47  ;;  %v1727_v12 = vmul.f32 -0.5, %v3661_v34 }
 0x3ac   :  { %v2454_v11 = vpop.eup %2453  ;;  %v1501_v4 = vmul.f32 1.442695, %v1474_v25  ;;  %v1948_v44 = vadd.f32 %v1923_v53, %v1714_v56  ;;  %vm1722_vm7 = vcmp.lt.f32.partialorder %v1721_v61, 0.0004427343  ;;  %v1659_v57 = vmul.f32 1.442695, %v1628_v43 }
 0x3ad   :  { %v2456_v39 = vpop.eup %2455  ;;  %v1996_v41 = vmul.f32 %v2452_v58, %v1971_v24  ;;  %v1548_v10 = vadd.f32 1.0, %v2454_v11  ;;  %v1604_v31 = vand.u32 2147483647, %v3415_v28  ;;  %v1924_v30 = vmax.f32 %v3378_v52, 0.0 }
 0x3ae   :  { %v1972_v19 = vmul.f32 %v2456_v39, %v1947_v8  ;;  %2461 = vpow2.f32 %v1501_v4  ;;  %v2458_v27 = vpop.eup %2457  ;;  %v1728_v2 = vadd.f32 1.0, %v1727_v12  ;;  %v1730_v11 = vand.u32 2147483647, %v3661_v34 }
 0x3af   :  { %v2021_v60 = vpack.c.bf16 %v1996_v41, %v1996_v41  ;;  %2463 = vrcp.f32 %v1548_v10  ;;  %v1185_v6 = vpop.f32.mrf.mxu1  ;;  %v3691_v0 = vpop.eup %2459  ;;  %v1717_v22 = vmul.f32 0.6931472, %v2458_v27  ;;  %v1629_v39 = vsub.f32 0.0, %v1604_v31 }
 0x3b0   :  { %v1997_v42 = vpack.c.bf16 %v1972_v19, %v1972_v19  ;;  %v1186_v21 = vadd.f32 %v1185_v6, %v1113_v16  ;;  %2465 = vlog2.f32 %v1724_v32  ;;  %v1733_v26 = vadd.f32 1.0, %v3691_v0 }
 0x3b1   :  { %2047 = vst.msk [vmem:[%s3820_s7 + $0x60] sm:$0xf] %vm2022_vm8, %v2021_v60  ;;  %2467 = vpow2.f32 %v1657_v40  ;;  %v1723_v15 = vsel %vm1722_vm7, %v1720_v23, %v1717_v22  ;;  %v1118_v5 = vadd.f32 %v3674_v14, %v3392_v50  ;;  %v1729_v10 = vmul.f32 %v3661_v34, %v1728_v2 }
 0x3b2   :  { %2023 = vst.msk [vmem:[%s3820_s7] sm:$0xf] %vm2022_vm8, %v1997_v42  ;;  %v1475_v63 = vsub.f32 0.0, %v1186_v21  ;;  %v1949_v24 = vadd.f32 %v1924_v30, %v1723_v15  ;;  %v1736_v16 = vmul.f32 -0.5, %v3691_v0  ;;  %vm1731_vm9 = vcmp.lt.f32.partialorder %v1730_v11, 0.0004427343 }
 0x3b3   :  { %v1661_v32 = vmul.f32 1.442695, %v1629_v39  ;;  %v1605_v42 = vand.u32 2147483647, %v3421_v1  ;;  %v1925_v50 = vmax.f32 %v3383_v3, 0.0  ;;  %v1121_v61 = vadd.f32 %v3674_v14, %v3397_v45 }
 0x3b4   :  { %v2462_v46 = vpop.eup %2461  ;;  %v1503_v37 = vmul.f32 1.442695, %v1475_v63  ;;  %v1737_v40 = vadd.f32 1.0, %v1736_v16  ;;  %v1739_v53 = vand.u32 2147483647, %v3691_v0  ;;  %v1926_v45 = vmax.f32 %v3394_v9, 0.0 }
 0x3b5   :  { %v2464_v62 = vpop.eup %2463  ;;  %v1549_v38 = vadd.f32 1.0, %v2462_v46 }
 0x3b6   :  { %v1973_v29 = vmul.f32 %v2464_v62, %v1948_v44  ;;  %2469 = vpow2.f32 %v1503_v37  ;;  %v2466_v25 = vpop.eup %2465  ;;  %v1630_v44 = vsub.f32 0.0, %v1605_v42  ;;  %v1738_v62 = vmul.f32 %v3691_v0, %v1737_v40  ;;  %v3840_v40 = vld [vmem:[#allocation2_spill] sm:$0xff] }
 0x3b7   :  { %2471 = vrcp.f32 %v1549_v38  ;;  %v1188_v55 = vpop.f32.mrf.mxu1  ;;  %v3705_v58 = vpop.eup %2467  ;;  %v1726_v4 = vmul.f32 0.6931472, %v2466_v25  ;;  %vm1740_vm10 = vcmp.lt.f32.partialorder %v1739_v53, 0.0004427343 }
 0x3b8   :  { %v1998_v18 = vpack.c.bf16 %v1973_v29, %v1973_v29  ;;  %v1189_v35 = vadd.f32 %v1188_v55, %v1116_v49  ;;  %2473 = vlog2.f32 %v1733_v26  ;;  %v1742_v48 = vadd.f32 1.0, %v3705_v58 }
 0x3b9   :  { %2475 = vpow2.f32 %v1659_v57  ;;  %v1732_v6 = vsel %vm1731_vm9, %v1729_v10, %v1726_v4  ;;  %v1745_v22 = vmul.f32 -0.5, %v3705_v58  ;;  %v1663_v12 = vmul.f32 1.442695, %v1630_v44  ;;  %v3839_v10 = vld [vmem:[#allocation6_spill] sm:$0xff] }
 0x3ba   :  { %2024 = vst.msk [vmem:[%s3820_s7 + $0x4] sm:$0xf] %vm2022_vm8, %v1998_v18  ;;  %v1476_v17 = vsub.f32 0.0, %v1189_v35  ;;  %v1950_v27 = vadd.f32 %v1925_v50, %v1732_v6  ;;  %v1606_v55 = vand.u32 2147483647, %v3426_v33 }
 0x3bb   :  { %v1746_v35 = vadd.f32 1.0, %v1745_v22  ;;  %v1748_v31 = vand.u32 2147483647, %v3705_v58  ;;  %v1607_v16 = vand.u32 2147483647, %v3839_v10 }
 0x3bc   :  { %v2470_v20 = vpop.eup %2469  ;;  %v1505_v8 = vmul.f32 1.442695, %v1476_v17  ;;  %v1631_v2 = vsub.f32 0.0, %v1606_v55 }
 0x3bd   :  { %v2472_v54 = vpop.eup %2471  ;;  %v1550_v52 = vadd.f32 1.0, %v2470_v20  ;;  %v1123_v20 = vadd.f32 %v3674_v14, %v3408_v51  ;;  %v1747_v11 = vmul.f32 %v3705_v58, %v1746_v35  ;;  %vm1749_vm11 = vcmp.lt.f32.partialorder %v1748_v31, 0.0004427343 }
 0x3be   :  { %v1974_v41 = vmul.f32 %v2472_v54, %v1949_v24  ;;  %2477 = vpow2.f32 %v1505_v8  ;;  %v2474_v21 = vpop.eup %2473  ;;  %v1927_v51 = vmax.f32 %v3399_v7, 0.0 }
 0x3bf   :  { %2479 = vrcp.f32 %v1550_v52  ;;  %v1190_v19 = vpop.f32.mrf.mxu1  ;;  %v3719_v56 = vpop.eup %2475  ;;  %v1735_v46 = vmul.f32 0.6931472, %v2474_v21 }
 0x3c0   :  { %v1999_v13 = vpack.c.bf16 %v1974_v41, %v1974_v41  ;;  %v1191_v60 = vadd.f32 %v1190_v19, %v1118_v5  ;;  %2481 = vlog2.f32 %v1742_v48  ;;  %v1751_v38 = vadd.f32 1.0, %v3719_v56 }
 0x3c1   :  { %2483 = vpow2.f32 %v1661_v32  ;;  %v1741_v23 = vsel %vm1740_vm10, %v1738_v62, %v1735_v46  ;;  %v1754_v8 = vmul.f32 -0.5, %v3719_v56  ;;  %v1665_v41 = vmul.f32 1.442695, %v1631_v2  ;;  %v3841_v62 = vld [vmem:[#allocation7_spill] sm:$0xff] }
 0x3c2   :  { %2025 = vst.msk [vmem:[%s3820_s7 + $0x8] sm:$0xf] %vm2022_vm8, %v1999_v13  ;;  %v1477_v34 = vsub.f32 0.0, %v1191_v60  ;;  %v1951_v57 = vadd.f32 %v1926_v45, %v1741_v23  ;;  %v1757_v32 = vand.u32 2147483647, %v3719_v56 }
 0x3c3   :  { %v1755_v13 = vadd.f32 1.0, %v1754_v8  ;;  %v1608_v22 = vand.u32 2147483647, %v3841_v62 }
 0x3c4   :  { %v2478_v36 = vpop.eup %2477  ;;  %v1507_v63 = vmul.f32 1.442695, %v1477_v34  ;;  %v1632_v34 = vsub.f32 0.0, %v1607_v16  ;;  %vm1758_vm12 = vcmp.lt.f32.partialorder %v1757_v32, 0.0004427343 }
 0x3c5   :  { %v2480_v47 = vpop.eup %2479  ;;  %v1551_v3 = vadd.f32 1.0, %v2478_v36  ;;  %v1126_v36 = vadd.f32 %v3674_v14, %v3840_v40  ;;  %v1756_v53 = vmul.f32 %v3719_v56, %v1755_v13  ;;  %v1633_v35 = vsub.f32 0.0, %v1608_v22  ;;  %v3844_v22 = vld [vmem:[#allocation5_spill] sm:$0xff] }
 0x3c6   :  { %v1975_v37 = vmul.f32 %v2480_v47, %v1950_v27  ;;  %2485 = vpow2.f32 %v1507_v63  ;;  %v2482_v26 = vpop.eup %2481 }
 0x3c7   :  { %2487 = vrcp.f32 %v1551_v3  ;;  %v1193_v43 = vpop.f32.mrf.mxu1  ;;  %v3733_v18 = vpop.eup %2483  ;;  %v1744_v17 = vmul.f32 0.6931472, %v2482_v26 }
 0x3c8   :  { %v2000_v49 = vpack.c.bf16 %v1975_v37, %v1975_v37  ;;  %v1194_v29 = vadd.f32 %v1193_v43, %v1121_v61  ;;  %2489 = vlog2.f32 %v1751_v38  ;;  %v1760_v4 = vadd.f32 1.0, %v3733_v18 }
 0x3c9   :  { %2491 = vpow2.f32 %v1663_v12  ;;  %v1750_v5 = vsel %vm1749_vm11, %v1747_v11, %v1744_v17  ;;  %v1763_v63 = vmul.f32 -0.5, %v3733_v18  ;;  %v1667_v37 = vmul.f32 1.442695, %v1632_v34 }
 0x3ca   :  { %2026 = vst.msk [vmem:[%s3820_s7 + $0xc] sm:$0xf] %vm2022_vm8, %v2000_v49  ;;  %v1478_v0 = vsub.f32 0.0, %v1194_v29  ;;  %v1952_v6 = vadd.f32 %v1927_v51, %v1750_v5  ;;  %v1928_v38 = vmax.f32 %v3410_v59, 0.0  ;;  %v1766_v55 = vand.u32 2147483647, %v3733_v18 }
 0x3cb   :  { %v1764_v29 = vadd.f32 1.0, %v1763_v63  ;;  %v1669_v11 = vmul.f32 1.442695, %v1633_v35 }
 0x3cc   :  { %v2486_v15 = vpop.eup %2485  ;;  %v1509_v25 = vmul.f32 1.442695, %v1478_v0  ;;  %vm1767_vm2 = vcmp.lt.f32.partialorder %v1766_v55, 0.0004427343 }
 0x3cd   :  { %v2488_v30 = vpop.eup %2487  ;;  %v1552_v9 = vadd.f32 1.0, %v2486_v15  ;;  %v3842_v15 = vld [vmem:[#allocation3_spill] sm:$0xff] }
 0x3ce   :  { %v1976_v24 = vmul.f32 %v2488_v30, %v1951_v57  ;;  %2493 = vpow2.f32 %v1509_v25  ;;  %v2490_v19 = vpop.eup %2489  ;;  %v1128_v57 = vadd.f32 %v3674_v14, %v3842_v15  ;;  %v1765_v25 = vmul.f32 %v3733_v18, %v1764_v29 }
 0x3cf   :  { %2495 = vrcp.f32 %v1552_v9  ;;  %v1195_v54 = vpop.f32.mrf.mxu1  ;;  %v3747_v48 = vpop.eup %2491  ;;  %v1753_v50 = vmul.f32 0.6931472, %v2490_v19 }
 0x3d0   :  { %v2001_v39 = vpack.c.bf16 %v1976_v24, %v1976_v24  ;;  %v1196_v52 = vadd.f32 %v1195_v54, %v1123_v20  ;;  %2497 = vlog2.f32 %v1760_v4  ;;  %v1769_v46 = vadd.f32 1.0, %v3747_v48 }
 0x3d1   :  { %2499 = vpow2.f32 %v1665_v41  ;;  %v1759_v61 = vsel %vm1758_vm12, %v1756_v53, %v1753_v50  ;;  %v1772_v30 = vmul.f32 -0.5, %v3747_v48  ;;  %v1929_v54 = vmax.f32 %v3415_v28, 0.0  ;;  %v3843_v28 = vld [vmem:[#allocation4_spill] sm:$0xff] }
 0x3d2   :  { %2027 = vst.msk [vmem:[%s3820_s7 + $0x10] sm:$0xf] %vm2022_vm8, %v2001_v39  ;;  %v1479_v58 = vsub.f32 0.0, %v1196_v52  ;;  %v1953_v12 = vadd.f32 %v1928_v38, %v1759_v61  ;;  %v1775_v41 = vand.u32 2147483647, %v3747_v48  ;;  %v1131_v13 = vadd.f32 %v3674_v14, %v3843_v28 }
 0x3d3   :  { %v1773_v39 = vadd.f32 1.0, %v1772_v30 }
 0x3d4   :  { %v2494_v60 = vpop.eup %2493  ;;  %v1511_v42 = vmul.f32 1.442695, %v1479_v58  ;;  %vm1776_vm13 = vcmp.lt.f32.partialorder %v1775_v41, 0.0004427343 }
 0x3d5   :  { %v2496_v21 = vpop.eup %2495  ;;  %v1553_v7 = vadd.f32 1.0, %v2494_v60 }
 0x3d6   :  { %v1977_v27 = vmul.f32 %v2496_v21, %v1952_v6  ;;  %2501 = vpow2.f32 %v1511_v42  ;;  %v2498_v43 = vpop.eup %2497  ;;  %v1774_v6 = vmul.f32 %v3747_v48, %v1773_v39 }
 0x3d7   :  { %2503 = vrcp.f32 %v1553_v7  ;;  %v1198_v47 = vpop.f32.mrf.mxu1  ;;  %v3761_v49 = vpop.eup %2499  ;;  %v1762_v0 = vmul.f32 0.6931472, %v2498_v43 }
 0x3d8   :  { %v2002_v44 = vpack.c.bf16 %v1977_v27, %v1977_v27  ;;  %v1199_v3 = vadd.f32 %v1198_v47, %v1126_v36  ;;  %2505 = vlog2.f32 %v1769_v46  ;;  %v1778_v2 = vadd.f32 1.0, %v3761_v49 }
 0x3d9   :  { %2507 = vpow2.f32 %v1667_v37  ;;  %v1768_v24 = vsel %vm1767_vm2, %v1765_v25, %v1762_v0  ;;  %v1781_v32 = vmul.f32 -0.5, %v3761_v49  ;;  %v1930_v36 = vmax.f32 %v3421_v1, 0.0 }
 0x3da   :  { %2028 = vst.msk [vmem:[%s3820_s7 + $0x14] sm:$0xf] %vm2022_vm8, %v2002_v44  ;;  %v1480_v56 = vsub.f32 0.0, %v1199_v3  ;;  %v1954_v5 = vadd.f32 %v1929_v54, %v1768_v24  ;;  %v1784_v46 = vand.u32 2147483647, %v3761_v49  ;;  %v1133_v1 = vadd.f32 %v3674_v14, %v3844_v22 }
 0x3db   :  { %v1782_v53 = vadd.f32 1.0, %v1781_v32  ;;  %v1931_v0 = vmax.f32 %v3426_v33, 0.0 }
 0x3dc   :  { %v2502_v23 = vpop.eup %2501  ;;  %v1513_v26 = vmul.f32 1.442695, %v1480_v56  ;;  %vm1785_vm14 = vcmp.lt.f32.partialorder %v1784_v46, 0.0004427343 }
 0x3dd   :  { %v2504_v45 = vpop.eup %2503  ;;  %v1554_v59 = vadd.f32 1.0, %v2502_v23  ;;  %v1783_v38 = vmul.f32 %v3761_v49, %v1782_v53 }
 0x3de   :  { %v1978_v31 = vmul.f32 %v2504_v45, %v1953_v12  ;;  %2509 = vpow2.f32 %v1513_v26  ;;  %v2506_v8 = vpop.eup %2505 }
 0x3df   :  { %2511 = vrcp.f32 %v1554_v59  ;;  %v1200_v17 = vpop.f32.mrf.mxu1  ;;  %v3774_v4 = vpop.eup %2507  ;;  %v1771_v51 = vmul.f32 0.6931472, %v2506_v8 }
 0x3e0   :  { %v2003_v9 = vpack.c.bf16 %v1978_v31, %v1978_v31  ;;  %v1201_v20 = vadd.f32 %v1200_v17, %v1128_v57  ;;  %2513 = vlog2.f32 %v1778_v2  ;;  %v1787_v21 = vadd.f32 1.0, %v3774_v4 }
 0x3e1   :  { %2515 = vpow2.f32 %v1669_v11  ;;  %v1777_v7 = vsel %vm1776_vm13, %v1774_v6, %v1771_v51  ;;  %v1790_v56 = vmul.f32 -0.5, %v3774_v4  ;;  %v1793_v15 = vand.u32 2147483647, %v3774_v4 }
 0x3e2   :  { %2029 = vst.msk [vmem:[%s3820_s7 + $0x18] sm:$0xf] %vm2022_vm8, %v2003_v9  ;;  %v1481_v18 = vsub.f32 0.0, %v1201_v20  ;;  %v1955_v47 = vadd.f32 %v1930_v36, %v1777_v7  ;;  %v1932_v11 = vmax.f32 %v3839_v10, 0.0  ;;  %v1933_v10 = vmax.f32 %v3841_v62, 0.0 }
 0x3e3   :  { %v1791_v35 = vadd.f32 1.0, %v1790_v56  ;;  %vm1794_vm15 = vcmp.lt.f32.partialorder %v1793_v15, 0.0004427343 }
 0x3e4   :  { %v2510_v52 = vpop.eup %2509  ;;  %v1515_v16 = vmul.f32 1.442695, %v1481_v18 }
 0x3e5   :  { %v2512_v19 = vpop.eup %2511  ;;  %v1555_v58 = vadd.f32 1.0, %v2510_v52  ;;  %v1792_v33 = vmul.f32 %v3774_v4, %v1791_v35 }
 0x3e6   :  { %v1979_v60 = vmul.f32 %v2512_v19, %v1954_v5  ;;  %2517 = vpow2.f32 %v1515_v16  ;;  %v2514_v40 = vpop.eup %2513 }
 0x3e7   :  { %2519 = vrcp.f32 %v1555_v58  ;;  %v1203_v42 = vpop.f32.mrf.mxu1  ;;  %v2516_v48 = vpop.eup %2515  ;;  %v1780_v61 = vmul.f32 0.6931472, %v2514_v40 }
 0x3e8   :  { %v2004_v50 = vpack.c.bf16 %v1979_v60, %v1979_v60  ;;  %v1204_v34 = vadd.f32 %v1203_v42, %v1131_v13  ;;  %2521 = vlog2.f32 %v1787_v21  ;;  %v1796_v23 = vadd.f32 1.0, %v2516_v48 }
 0x3e9   :  { %v1786_v26 = vsel %vm1785_vm14, %v1783_v38, %v1780_v61  ;;  %v1799_v2 = vmul.f32 -0.5, %v2516_v48  ;;  %v1802_v39 = vand.u32 2147483647, %v2516_v48 }
 0x3ea   :  { %2030 = vst.msk [vmem:[%s3820_s7 + $0x1c] sm:$0xf] %vm2022_vm8, %v2004_v50  ;;  %v1482_v27 = vsub.f32 0.0, %v1204_v34  ;;  %v1956_v59 = vadd.f32 %v1931_v0, %v1786_v26 }
 0x3eb   :  { %v1800_v8 = vadd.f32 1.0, %v1799_v2  ;;  %vm1803_vm0 = vcmp.lt.f32.partialorder %v1802_v39, 0.0004427343 }
 0x3ec   :  { %v2518_v63 = vpop.eup %2517  ;;  %v1517_v44 = vmul.f32 1.442695, %v1482_v27 }
 0x3ed   :  { %v2520_v3 = vpop.eup %2519  ;;  %v1556_v37 = vadd.f32 1.0, %v2518_v63  ;;  %v1801_v16 = vmul.f32 %v2516_v48, %v1800_v8 }
 0x3ee   :  { %v1980_v43 = vmul.f32 %v2520_v3, %v1955_v47  ;;  %2523 = vpow2.f32 %v1517_v44  ;;  %v2522_v45 = vpop.eup %2521 }
 0x3ef   :  { %2525 = vrcp.f32 %v1556_v37  ;;  %v1205_v29 = vpop.f32.mrf.mxu1  ;;  %v1789_v25 = vmul.f32 0.6931472, %v2522_v45 }
 0x3f0   :  { %v2005_v12 = vpack.c.bf16 %v1980_v43, %v1980_v43  ;;  %v1206_v55 = vadd.f32 %v1205_v29, %v1133_v1  ;;  %2527 = vlog2.f32 %v1796_v23 }
 0x3f1   :  { %v1795_v20 = vsel %vm1794_vm15, %v1792_v33, %v1789_v25 }
 0x3f2   :  { %2031 = vst.msk [vmem:[%s3820_s7 + $0x20] sm:$0xf] %vm2022_vm8, %v2005_v12  ;;  %v1483_v14 = vsub.f32 0.0, %v1206_v55  ;;  %v1957_v18 = vadd.f32 %v1932_v11, %v1795_v20 }
 0x3f4   :  { %v2524_v49 = vpop.eup %2523  ;;  %v1519_v57 = vmul.f32 1.442695, %v1483_v14 }
 0x3f5   :  { %v2526_v31 = vpop.eup %2525  ;;  %v1557_v30 = vadd.f32 1.0, %v2524_v49 }
 0x3f6   :  { %v1981_v17 = vmul.f32 %v2526_v31, %v1956_v59  ;;  %2529 = vpow2.f32 %v1519_v57  ;;  %v2528_v24 = vpop.eup %2527 }
 0x3f7   :  { %2531 = vrcp.f32 %v1557_v30  ;;  %v1798_v5 = vmul.f32 0.6931472, %v2528_v24 }
 0x3f8   :  { %v2006_v9 = vpack.c.bf16 %v1981_v17, %v1981_v17 }
 0x3f9   :  { %v1804_v51 = vsel %vm1803_vm0, %v1801_v16, %v1798_v5 }
 0x3fa   :  { %2032 = vst.msk [vmem:[%s3820_s7 + $0x24] sm:$0xf] %vm2022_vm8, %v2006_v9  ;;  %v1958_v58 = vadd.f32 %v1933_v10, %v1804_v51 }
 0x3fc   :  { %v2530_v54 = vpop.eup %2529 }
 0x3fd   :  { %v2532_v52 = vpop.eup %2531  ;;  %v1558_v4 = vadd.f32 1.0, %v2530_v54 }
 0x3fe   :  { %v1982_v41 = vmul.f32 %v2532_v52, %v1957_v18 }
 0x3ff   :  { %2533 = vrcp.f32 %v1558_v4 }
 0x400   :  { %v2007_v19 = vpack.c.bf16 %v1982_v41, %v1982_v41 }
 0x402   :  { %2033 = vst.msk [vmem:[%s3820_s7 + $0x28] sm:$0xf] %vm2022_vm8, %v2007_v19 }
 0x405   :  { %v2534_v28 = vpop.eup %2533 }
 0x406   :  { %v1983_v13 = vmul.f32 %v2534_v28, %v1958_v58 }
 0x408   :  { %v2008_v60 = vpack.c.bf16 %v1983_v13, %v1983_v13 }
 0x40a   :  { %2034 = vst.msk [vmem:[%s3820_s7 + $0x2c] sm:$0xf] %vm2022_vm8, %v2008_v60 }

</bundles_post_ra>
